<compile_context>
chip_gen: v6e
topology: v6e:2x2x1
jax: 0.10.0
libtpu: 0.0.40
codegen_flags: <defaults>
</compile_context>

<pallas_src>
import math
import jax
import jax.numpy as jnp
from jax import lax
from jax.experimental import pallas as pl
from jax.experimental.pallas import tpu as pltpu

# ---- model hyper-params (Mamba defaults: expand=2, d_state=16, d_conv=4) ----
DIM = 32
EXPAND = 2
D_STATE = 16
D_CONV = 4
D_INNER = EXPAND * DIM            # 64
DI2 = 2 * D_INNER                 # 128: both directions lane-packed into one vreg width
DT_RANK = math.ceil(DIM / 16)     # 2
MLP_FACTOR = 4
HIDDEN = DIM * MLP_FACTOR         # 128
LN_EPS = 1e-5
BATCH = 2
SEQ = 8

SQRT_HALF = 0.7071067811865476


# ---------------- in-kernel elementwise helpers ----------------
def _gelu(v):  # exact GELU (nn.GELU default, erf form)
    return 0.5 * v * (1.0 + lax.erf(v * SQRT_HALF))


def _silu(v):
    return v * (1.0 / (1.0 + jnp.exp(-v)))


def _softplus(v):  # F.softplus, numerically stable
    return jnp.maximum(v, 0.0) + jnp.log1p(jnp.exp(-jnp.abs(v)))


def _ln(v, g, b):  # LayerNorm over the last dim
    mu = jnp.mean(v, axis=-1, keepdims=True)
    var = jnp.mean((v - mu) ** 2, axis=-1, keepdims=True)
    return (v - mu) * lax.rsqrt(var + LN_EPS) * g + b


# ---------------- fused per-batch kernel (both Mamba directions lane-packed) ----------------
def _fused_kernel(x_ref, ln1_g_ref, ln1_b_ref,
                  w_in_ref, conv_w_ref, conv_b_ref, w_delta_ref, b_dt_ref,
                  w_bc_ref, a_ref, d_ref, w_out_ref,
                  ln2_g_ref, ln2_b_ref, ff1_w_ref, ff1_b_ref, ff2_w_ref, ff2_b_ref,
                  o_ref, bcast_scr, ccast_scr, y_scr):
    L = x_ref.shape[0]
    x = x_ref[...]                                                        # (L, D)

    # pre-Mamba LayerNorm
    h = _ln(x, ln1_g_ref[...], ln1_b_ref[...])

    # backward branch consumes flip(h, seq axis): in-VMEM reversal-permutation matmul,
    # then both direction inputs are lane-concatenated to (L, 2*D) = (8, 64).
    row = lax.broadcasted_iota(jnp.int32, (L, L), 0)
    col = lax.broadcasted_iota(jnp.int32, (L, L), 1)
    P = (row + col == L - 1).astype(jnp.float32)
    h_rev = jnp.dot(P, h, preferred_element_type=jnp.float32)
    h2 = jnp.concatenate([h, h_rev], axis=1)                              # (L, 2*D)

    # fused in_proj for BOTH directions (block-diag weights): cols [xi0|xi1|z0|z1]
    xz = jnp.dot(h2, w_in_ref[...], preferred_element_type=jnp.float32)   # (L, 4*D_INNER)
    xi = xz[:, :DI2]                                                      # (L, 128) lane-dense
    z = xz[:, DI2:]                                                       # (L, 128)

    # causal depthwise conv1d over L (kernel D_CONV, left zero pad) + SiLU.
    # Taps = sublane roll (XLU) + iota mask (VPU): no tiny MXU round-trips.
    rowv = lax.broadcasted_iota(jnp.int32, (L, 1), 0)
    conv_w = conv_w_ref[...]                                              # (D_CONV, 2*D_INNER)
    acc = conv_b_ref[...] + xi * conv_w[D_CONV - 1:D_CONV, :]             # shift-0 tap
    for s in range(1, D_CONV):
        shifted = jnp.where(rowv >= s, pltpu.roll(xi, shift=s, axis=0), 0.0)
        acc = acc + shifted * conv_w[D_CONV - 1 - s:D_CONV - s, :]
    u = _silu(acc)                                                        # (L, 128)

    # delta for both dirs: x_proj dt-slice folded into dt_proj (exact composition),
    # delta_bias added before softplus (delta_softplus=True).
    delta = _softplus(
        jnp.dot(u, w_delta_ref[...], preferred_element_type=jnp.float32) + b_dt_ref[...])

    # B / C projections for both dirs: cols [B0|B1|C0|C1], 16-aligned slices
    bc = jnp.dot(u, w_bc_ref[...], preferred_element_type=jnp.float32)    # (L, 4*D_STATE)
    b0 = bc[:, 0 * D_STATE:1 * D_STATE]
    b1 = bc[:, 1 * D_STATE:2 * D_STATE]
    c0 = bc[:, 2 * D_STATE:3 * D_STATE]
    c1 = bc[:, 3 * D_STATE:4 * D_STATE]

    # Broadcast B/C into the lane-packed state layout ONCE (off the scan's dependent
    # chain) and stage in VMEM scratch, so the unrolled scan only keeps tiny live values.
    lane = lax.broadcasted_iota(jnp.int32, (1, 1, DI2), 2)
    mask0 = (lane < D_INNER).astype(jnp.float32)
    mask1 = 1.0 - mask0
    bcast_scr[...] = b0[:, :, None] * mask0 + b1[:, :, None] * mask1      # (L, D_STATE, 2*D_INNER)
    ccast_scr[...] = c0[:, :, None] * mask0 + c1[:, :, None] * mask1

    du = delta * u                                                        # (L, 128)
    A = a_ref[...]                                                        # (D_STATE, 2*D_INNER), A = -exp(A_log)

    # selective scan: state (D_STATE, 2*D_INNER) = (16, 128) carries BOTH directions;
    # per-step dA is computed in the loop (no (L, D_STATE, d) tensors live across steps).
    hs = jnp.zeros((D_STATE, DI2), jnp.float32)
    for l in range(L):                                                    # L static & tiny -> unrolled
        dA_l = jnp.exp(delta[l:l + 1, :] * A)                             # (16, 128)
        hs = dA_l * hs + du[l:l + 1, :] * bcast_scr[l]
        y_scr[l, :] = jnp.sum(hs * ccast_scr[l], axis=0)                  # row write to VMEM scratch
    y = y_scr[...]                                                        # (L, 128)

    # skip (D), gate with SiLU(z), fused out_proj: [W_out1; W_out2] on the contraction
    # axis -> the single matmul result is already fwd + bwd.
    y = (y + u * d_ref[...]) * _silu(z)
    ssm = jnp.dot(y, w_out_ref[...], preferred_element_type=jnp.float32)  # (L, D) = fwd + bwd

    # block output: GELU(fwd + bwd + x) + x; drop_path/dropout are identity (p=0).
    # Note: the PyTorch module does NOT re-flip the backward branch before summing.
    x1 = x + _gelu(ssm + x)

    # FeedForward: LayerNorm -> Linear -> GELU -> Linear, with residual
    hn = _ln(x1, ln2_g_ref[...], ln2_b_ref[...])
    h1 = _gelu(jnp.dot(hn, ff1_w_ref[...], preferred_element_type=jnp.float32) + ff1_b_ref[...])
    out = jnp.dot(h1, ff2_w_ref[...], preferred_element_type=jnp.float32) + ff2_b_ref[...]
    o_ref[...] = (x1 + out).astype(o_ref.dtype)


# ---------------- wrapper: lane-packed param fusion + single pallas_call ----------------
def _fuse_params(params):
    m1, m2 = params["mamba1"], params["mamba2"]
    zDI = jnp.zeros((DIM, D_INNER), jnp.float32)
    zII = jnp.zeros((D_INNER, D_INNER), jnp.float32)
    zIS = jnp.zeros((D_INNER, D_STATE), jnp.float32)

    # in_proj, block-diag over direction. rows: [h | h_rev]; cols: [xi0|xi1|z0|z1]
    w_in = jnp.concatenate([
        jnp.concatenate([m1["w_in_x"], zDI, m1["w_in_z"], zDI], axis=1),
        jnp.concatenate([zDI, m2["w_in_x"], zDI, m2["w_in_z"]], axis=1)], axis=0)   # (2D, 4*D_INNER)

    conv_w = jnp.concatenate([m1["conv_w"], m2["conv_w"]], axis=1)                  # (D_CONV, 2*D_INNER)
    conv_b = jnp.concatenate([m1["conv_b"], m2["conv_b"]], axis=1)                  # (1, 2*D_INNER)

    # dt path: (x_proj dt-slice) @ dt_proj composed per direction, then block-diag
    w_delta = jnp.concatenate([
        jnp.concatenate([m1["w_x_dt"] @ m1["w_dt"], zII], axis=1),
        jnp.concatenate([zII, m2["w_x_dt"] @ m2["w_dt"]], axis=1)], axis=0)          # (2*D_INNER, 2*D_INNER)
    b_dt = jnp.concatenate([m1["b_dt"], m2["b_dt"]], axis=1)                         # (1, 2*D_INNER)

    # B/C projections, cols [B0|B1|C0|C1]
    w_bc = jnp.concatenate([
        jnp.concatenate([m1["w_x_b"], zIS, m1["w_x_c"], zIS], axis=1),
        jnp.concatenate([zIS, m2["w_x_b"], zIS, m2["w_x_c"]], axis=1)], axis=0)      # (2*D_INNER, 4*D_STATE)

    a_f = jnp.concatenate([m1["A_t"], m2["A_t"]], axis=1)                            # (D_STATE, 2*D_INNER)
    d_f = jnp.concatenate([m1["D"], m2["D"]], axis=1)                                # (1, 2*D_INNER)
    w_out = jnp.concatenate([m1["w_out"], m2["w_out"]], axis=0)                      # (2*D_INNER, D)
    return w_in, conv_w, conv_b, w_delta, b_dt, w_bc, a_f, d_f, w_out


@jax.jit
def bidirectional_add_ff_block(x, params):
    B, L, D = x.shape
    w_in, conv_w, conv_b, w_delta, b_dt, w_bc, a_f, d_f, w_out = _fuse_params(params)

    def rep(a):  # whole-array block, reused by every grid step (fetched once)
        nd = a.ndim
        return pl.BlockSpec(a.shape, lambda b, nd=nd: (0,) * nd)

    tok = pl.BlockSpec((None, L, D), lambda b: (b, 0, 0))

    inputs = [
        x,
        params["ln1_g"].reshape(1, D), params["ln1_b"].reshape(1, D),
        w_in, conv_w, conv_b, w_delta, b_dt, w_bc, a_f, d_f, w_out,
        params["ln2_g"].reshape(1, D), params["ln2_b"].reshape(1, D),
        params["ff1_w"], params["ff1_b"].reshape(1, HIDDEN),
        params["ff2_w"], params["ff2_b"].reshape(1, D),
    ]
    in_specs = [tok] + [rep(a) for a in inputs[1:]]

    # grid=(B,) "parallel": one batch element per TensorCore on v7x; on single-TC
    # v5e/v6e the extra grid step only costs fixed per-step overhead at this size.
    return pl.pallas_call(
        _fused_kernel,
        out_shape=jax.ShapeDtypeStruct((B, L, D), x.dtype),
        grid=(B,),
        in_specs=in_specs,
        out_specs=pl.BlockSpec((None, L, D), lambda b: (b, 0, 0)),
        scratch_shapes=[pltpu.VMEM((L, D_STATE, DI2), jnp.float32),   # B broadcast (staged)
                        pltpu.VMEM((L, D_STATE, DI2), jnp.float32),   # C broadcast (staged)
                        pltpu.VMEM((L, DI2), jnp.float32)],           # scan outputs
        compiler_params=pltpu.CompilerParams(dimension_semantics=("parallel",)),
    )(*inputs)


# ---------------- deterministic parameter init (mirrors the PyTorch module) ----------------
def init_mamba_params(key, dim):
    d_inner = EXPAND * dim
    dt_rank = math.ceil(dim / 16)
    ks = jax.random.split(key, 9)

    def w(k, shape, scale=0.05):
        return (scale * jax.random.normal(k, shape, jnp.float32)).astype(jnp.float32)

    # A_log init: log(arange(1..d_state)) per channel  =>  A = -exp(A_log) = -arange(1..d_state)
    A = jnp.tile(jnp.arange(1, D_STATE + 1, dtype=jnp.float32)[None, :], (d_inner, 1))  # (d_inner, d_state)
    return {
        "w_in_x": w(ks[0], (dim, d_inner)),
        "w_in_z": w(ks[1], (dim, d_inner)),
        "conv_w": w(ks[2], (D_CONV, d_inner), 0.2),
        "conv_b": w(ks[3], (1, d_inner), 0.1),
        "w_x_dt": w(ks[4], (d_inner, dt_rank)),
        "w_x_b": w(ks[5], (d_inner, D_STATE)),
        "w_x_c": w(ks[6], (d_inner, D_STATE)),
        "w_dt": w(ks[7], (dt_rank, d_inner), 0.2),
        "b_dt": w(ks[8], (1, d_inner), 0.1),
        "A_t": (-A).T,                                   # (d_state, d_inner)
        "D": jnp.ones((1, d_inner), jnp.float32),
        "w_out": w(jax.random.fold_in(key, 99), (d_inner, dim)),
    }


def init_params(key):
    k1, k2, k3, k4, k5, k6 = jax.random.split(key, 6)
    return {
        "ln1_g": jnp.ones((DIM,), jnp.float32),
        "ln1_b": jnp.zeros((DIM,), jnp.float32),
        "ln2_g": jnp.ones((DIM,), jnp.float32),
        "ln2_b": jnp.zeros((DIM,), jnp.float32),
        "mamba1": init_mamba_params(k1, DIM),
        "mamba2": init_mamba_params(k2, DIM),
        "ff1_w": 0.05 * jax.random.normal(k3, (DIM, HIDDEN), jnp.float32),
        "ff1_b": 0.05 * jax.random.normal(k4, (HIDDEN,), jnp.float32),
        "ff2_w": 0.05 * jax.random.normal(k5, (HIDDEN, DIM), jnp.float32),
        "ff2_b": 0.05 * jax.random.normal(k6, (DIM,), jnp.float32),
    }
    # TODO(synk): Dropout / DropPath have p=0 (module defaults) and are identity at inference; no RNG path implemented.


if __name__ == "__main__":
    key = jax.random.PRNGKey(0)
    kx, kp = jax.random.split(key)
    x = jax.random.normal(kx, (BATCH, SEQ, DIM), jnp.float32)
    params = init_params(kp)

    out = bidirectional_add_ff_block(x, params)
    out = jax.block_until_ready(out)
    assert out.shape == (BATCH, SEQ, DIM)
    assert bool(jnp.all(jnp.isfinite(out)))
    print("KERNEL_OK")
</pallas_src>

<mosaic_0001>
module attributes {stable_mosaic.version = 11 : i64} {
  func.func @_fused_kernel(%arg0: i32, %arg1: memref<1x8x32xf32, #tpu.memory_space<vmem>>, %arg2: memref<1x32xf32, #tpu.memory_space<vmem>>, %arg3: memref<1x32xf32, #tpu.memory_space<vmem>>, %arg4: memref<64x256xf32, #tpu.memory_space<vmem>>, %arg5: memref<4x128xf32, #tpu.memory_space<vmem>>, %arg6: memref<1x128xf32, #tpu.memory_space<vmem>>, %arg7: memref<128x128xf32, #tpu.memory_space<vmem>>, %arg8: memref<1x128xf32, #tpu.memory_space<vmem>>, %arg9: memref<128x64xf32, #tpu.memory_space<vmem>>, %arg10: memref<16x128xf32, #tpu.memory_space<vmem>>, %arg11: memref<1x128xf32, #tpu.memory_space<vmem>>, %arg12: memref<128x32xf32, #tpu.memory_space<vmem>>, %arg13: memref<1x32xf32, #tpu.memory_space<vmem>>, %arg14: memref<1x32xf32, #tpu.memory_space<vmem>>, %arg15: memref<32x128xf32, #tpu.memory_space<vmem>>, %arg16: memref<1x128xf32, #tpu.memory_space<vmem>>, %arg17: memref<128x32xf32, #tpu.memory_space<vmem>>, %arg18: memref<1x32xf32, #tpu.memory_space<vmem>>, %arg19: memref<1x8x32xf32, #tpu.memory_space<vmem>>, %arg20: memref<8x16x128xf32, #tpu.memory_space<vmem>>, %arg21: memref<8x16x128xf32, #tpu.memory_space<vmem>>, %arg22: memref<8x128xf32, #tpu.memory_space<vmem>>) attributes {dimension_semantics = [#tpu.dimension_semantics<parallel>], iteration_bounds = array<i64: 2>, scalar_prefetch = 0 : i64, scratch_operands = 3 : i64, tpu.core_type = #tpu.core_type<tc>, window_params = [{transform_indices = @transform_0, window_bounds = array<i64: 1, 8, 32>}, {pipeline_mode = #tpu.pipeline_mode<synchronous>, transform_indices = @transform_1, window_bounds = array<i64: 1, 32>}, {pipeline_mode = #tpu.pipeline_mode<synchronous>, transform_indices = @transform_2, window_bounds = array<i64: 1, 32>}, {pipeline_mode = #tpu.pipeline_mode<synchronous>, transform_indices = @transform_3, window_bounds = array<i64: 64, 256>}, {pipeline_mode = #tpu.pipeline_mode<synchronous>, transform_indices = @transform_4, window_bounds = array<i64: 4, 128>}, {pipeline_mode = #tpu.pipeline_mode<synchronous>, transform_indices = @transform_5, window_bounds = array<i64: 1, 128>}, {pipeline_mode = #tpu.pipeline_mode<synchronous>, transform_indices = @transform_6, window_bounds = array<i64: 128, 128>}, {pipeline_mode = #tpu.pipeline_mode<synchronous>, transform_indices = @transform_7, window_bounds = array<i64: 1, 128>}, {pipeline_mode = #tpu.pipeline_mode<synchronous>, transform_indices = @transform_8, window_bounds = array<i64: 128, 64>}, {pipeline_mode = #tpu.pipeline_mode<synchronous>, transform_indices = @transform_9, window_bounds = array<i64: 16, 128>}, {pipeline_mode = #tpu.pipeline_mode<synchronous>, transform_indices = @transform_10, window_bounds = array<i64: 1, 128>}, {pipeline_mode = #tpu.pipeline_mode<synchronous>, transform_indices = @transform_11, window_bounds = array<i64: 128, 32>}, {pipeline_mode = #tpu.pipeline_mode<synchronous>, transform_indices = @transform_12, window_bounds = array<i64: 1, 32>}, {pipeline_mode = #tpu.pipeline_mode<synchronous>, transform_indices = @transform_13, window_bounds = array<i64: 1, 32>}, {pipeline_mode = #tpu.pipeline_mode<synchronous>, transform_indices = @transform_14, window_bounds = array<i64: 32, 128>}, {pipeline_mode = #tpu.pipeline_mode<synchronous>, transform_indices = @transform_15, window_bounds = array<i64: 1, 128>}, {pipeline_mode = #tpu.pipeline_mode<synchronous>, transform_indices = @transform_16, window_bounds = array<i64: 128, 32>}, {pipeline_mode = #tpu.pipeline_mode<synchronous>, transform_indices = @transform_17, window_bounds = array<i64: 1, 32>}, {transform_indices = @transform_18, window_bounds = array<i64: 1, 8, 32>}]} {
    %c0 = arith.constant 0 : index
    %c0_0 = arith.constant 0 : index
    %c0_1 = arith.constant 0 : index
    %0 = vector.load %arg1[%c0, %c0_0, %c0_1] : memref<1x8x32xf32, #tpu.memory_space<vmem>>, vector<1x8x32xf32>
    %1 = vector.shape_cast %0 : vector<1x8x32xf32> to vector<8x32xf32>
    %c0_2 = arith.constant 0 : index
    %c0_3 = arith.constant 0 : index
    %2 = vector.load %arg2[%c0_2, %c0_3] : memref<1x32xf32, #tpu.memory_space<vmem>>, vector<1x32xf32>
    %c0_4 = arith.constant 0 : index
    %c0_5 = arith.constant 0 : index
    %3 = vector.load %arg3[%c0_4, %c0_5] : memref<1x32xf32, #tpu.memory_space<vmem>>, vector<1x32xf32>
    %cst = arith.constant dense<0.000000e+00> : vector<8xf32>
    %4 = vector.multi_reduction <add>, %1, %cst [1] : vector<8x32xf32> to vector<8xf32>
    %5 = vector.shape_cast %4 : vector<8xf32> to vector<8x1xf32>
    %cst_6 = arith.constant 3.200000e+01 : f32
    %6 = vector.broadcast %cst_6 : f32 to vector<8x1xf32>
    %7 = arith.divf %5, %6 : vector<8x1xf32>
    %8 = vector.broadcast %7 : vector<8x1xf32> to vector<8x32xf32>
    %9 = arith.subf %1, %8 : vector<8x32xf32>
    %10 = arith.mulf %9, %9 : vector<8x32xf32>
    %cst_7 = arith.constant dense<0.000000e+00> : vector<8xf32>
    %11 = vector.multi_reduction <add>, %10, %cst_7 [1] : vector<8x32xf32> to vector<8xf32>
    %12 = vector.shape_cast %11 : vector<8xf32> to vector<8x1xf32>
    %cst_8 = arith.constant 3.200000e+01 : f32
    %13 = vector.broadcast %cst_8 : f32 to vector<8x1xf32>
    %14 = arith.divf %12, %13 : vector<8x1xf32>
    %15 = vector.broadcast %7 : vector<8x1xf32> to vector<8x32xf32>
    %16 = arith.subf %1, %15 : vector<8x32xf32>
    %cst_9 = arith.constant 9.99999974E-6 : f32
    %17 = vector.broadcast %cst_9 : f32 to vector<8x1xf32>
    %18 = arith.addf %14, %17 : vector<8x1xf32>
    %19 = math.rsqrt %18 : vector<8x1xf32>
    %20 = vector.broadcast %19 : vector<8x1xf32> to vector<8x32xf32>
    %21 = arith.mulf %16, %20 : vector<8x32xf32>
    %22 = vector.broadcast %2 : vector<1x32xf32> to vector<8x32xf32>
    %23 = arith.mulf %21, %22 : vector<8x32xf32>
    %24 = vector.broadcast %3 : vector<1x32xf32> to vector<8x32xf32>
    %25 = arith.addf %23, %24 : vector<8x32xf32>
    %26 = tpu.iota {dimensions = array<i32: 0>} : vector<8x8xi32>
    %27 = tpu.iota {dimensions = array<i32: 1>} : vector<8x8xi32>
    %28 = arith.addi %26, %27 : vector<8x8xi32>
    %c7_i32 = arith.constant 7 : i32
    %29 = vector.broadcast %c7_i32 : i32 to vector<8x8xi32>
    %30 = arith.cmpi eq, %28, %29 : vector<8x8xi32>
    %31 = arith.extui %30 : vector<8x8xi1> to vector<8x8xi32>
    %32 = arith.sitofp %31 : vector<8x8xi32> to vector<8x8xf32>
    %cst_10 = arith.constant dense<0.000000e+00> : vector<8x32xf32>
    %33 = tpu.matmul %32, %25, %cst_10 {dimension_numbers = #tpu.dot_dimension_numbers<[1], [0], [0], [1], [0, 0, 1, 1], [], []>} : vector<8x8xf32>, vector<8x32xf32>, vector<8x32xf32> -> vector<8x32xf32>
    %34 = tpu.concatenate %25, %33 in 1 : vector<8x32xf32>, vector<8x32xf32> -> vector<8x64xf32>
    %c0_11 = arith.constant 0 : index
    %c0_12 = arith.constant 0 : index
    %35 = vector.load %arg4[%c0_11, %c0_12] : memref<64x256xf32, #tpu.memory_space<vmem>>, vector<64x256xf32>
    %cst_13 = arith.constant dense<0.000000e+00> : vector<8x256xf32>
    %36 = tpu.matmul %34, %35, %cst_13 {dimension_numbers = #tpu.dot_dimension_numbers<[1], [0], [0], [1], [0, 0, 1, 1], [], []>} : vector<8x64xf32>, vector<64x256xf32>, vector<8x256xf32> -> vector<8x256xf32>
    %37 = vector.extract_strided_slice %36 {offsets = [0, 0], sizes = [8, 128], strides = [1, 1]} : vector<8x256xf32> to vector<8x128xf32>
    %38 = vector.extract_strided_slice %36 {offsets = [0, 128], sizes = [8, 128], strides = [1, 1]} : vector<8x256xf32> to vector<8x128xf32>
    %39 = tpu.iota {dimensions = array<i32: 0>} : vector<8x1xi32>
    %c0_14 = arith.constant 0 : index
    %c0_15 = arith.constant 0 : index
    %40 = vector.load %arg5[%c0_14, %c0_15] : memref<4x128xf32, #tpu.memory_space<vmem>>, vector<4x128xf32>
    %c0_16 = arith.constant 0 : index
    %c0_17 = arith.constant 0 : index
    %41 = vector.load %arg6[%c0_16, %c0_17] : memref<1x128xf32, #tpu.memory_space<vmem>>, vector<1x128xf32>
    %42 = vector.extract_strided_slice %40 {offsets = [3, 0], sizes = [1, 128], strides = [1, 1]} : vector<4x128xf32> to vector<1x128xf32>
    %43 = vector.broadcast %42 : vector<1x128xf32> to vector<8x128xf32>
    %44 = arith.mulf %37, %43 : vector<8x128xf32>
    %45 = vector.broadcast %41 : vector<1x128xf32> to vector<8x128xf32>
    %46 = arith.addf %45, %44 : vector<8x128xf32>
    %c1_i32 = arith.constant 1 : i32
    %47 = vector.broadcast %c1_i32 : i32 to vector<8x1xi32>
    %48 = arith.cmpi sge, %39, %47 : vector<8x1xi32>
    %c1_i32_18 = arith.constant 1 : i32
    %49 = tpu.dynamic_rotate %37 by %c1_i32_18 dim 0 : vector<8x128xf32>, i32 -> vector<8x128xf32>
    %cst_19 = arith.constant 0.000000e+00 : f32
    %50 = vector.shape_cast %48 : vector<8x1xi1> to vector<8x1xi1>
    %51 = vector.broadcast %50 : vector<8x1xi1> to vector<8x128xi1>
    %52 = vector.broadcast %cst_19 : f32 to vector<8x128xf32>
    %53 = arith.select %51, %49, %52 : vector<8x128xi1>, vector<8x128xf32>
    %54 = vector.extract_strided_slice %40 {offsets = [2, 0], sizes = [1, 128], strides = [1, 1]} : vector<4x128xf32> to vector<1x128xf32>
    %55 = vector.broadcast %54 : vector<1x128xf32> to vector<8x128xf32>
    %56 = arith.mulf %53, %55 : vector<8x128xf32>
    %57 = arith.addf %46, %56 : vector<8x128xf32>
    %c2_i32 = arith.constant 2 : i32
    %58 = vector.broadcast %c2_i32 : i32 to vector<8x1xi32>
    %59 = arith.cmpi sge, %39, %58 : vector<8x1xi32>
    %c2_i32_20 = arith.constant 2 : i32
    %60 = tpu.dynamic_rotate %37 by %c2_i32_20 dim 0 : vector<8x128xf32>, i32 -> vector<8x128xf32>
    %cst_21 = arith.constant 0.000000e+00 : f32
    %61 = vector.shape_cast %59 : vector<8x1xi1> to vector<8x1xi1>
    %62 = vector.broadcast %61 : vector<8x1xi1> to vector<8x128xi1>
    %63 = vector.broadcast %cst_21 : f32 to vector<8x128xf32>
    %64 = arith.select %62, %60, %63 : vector<8x128xi1>, vector<8x128xf32>
    %65 = vector.extract_strided_slice %40 {offsets = [1, 0], sizes = [1, 128], strides = [1, 1]} : vector<4x128xf32> to vector<1x128xf32>
    %66 = vector.broadcast %65 : vector<1x128xf32> to vector<8x128xf32>
    %67 = arith.mulf %64, %66 : vector<8x128xf32>
    %68 = arith.addf %57, %67 : vector<8x128xf32>
    %c3_i32 = arith.constant 3 : i32
    %69 = vector.broadcast %c3_i32 : i32 to vector<8x1xi32>
    %70 = arith.cmpi sge, %39, %69 : vector<8x1xi32>
    %c3_i32_22 = arith.constant 3 : i32
    %71 = tpu.dynamic_rotate %37 by %c3_i32_22 dim 0 : vector<8x128xf32>, i32 -> vector<8x128xf32>
    %cst_23 = arith.constant 0.000000e+00 : f32
    %72 = vector.shape_cast %70 : vector<8x1xi1> to vector<8x1xi1>
    %73 = vector.broadcast %72 : vector<8x1xi1> to vector<8x128xi1>
    %74 = vector.broadcast %cst_23 : f32 to vector<8x128xf32>
    %75 = arith.select %73, %71, %74 : vector<8x128xi1>, vector<8x128xf32>
    %76 = vector.extract_strided_slice %40 {offsets = [0, 0], sizes = [1, 128], strides = [1, 1]} : vector<4x128xf32> to vector<1x128xf32>
    %77 = vector.broadcast %76 : vector<1x128xf32> to vector<8x128xf32>
    %78 = arith.mulf %75, %77 : vector<8x128xf32>
    %79 = arith.addf %68, %78 : vector<8x128xf32>
    %cst_24 = arith.constant 0.000000e+00 : f32
    %80 = vector.broadcast %cst_24 : f32 to vector<8x128xf32>
    %81 = arith.subf %80, %79 : vector<8x128xf32>
    %82 = math.exp %81 : vector<8x128xf32>
    %cst_25 = arith.constant 1.000000e+00 : f32
    %83 = vector.broadcast %cst_25 : f32 to vector<8x128xf32>
    %84 = arith.addf %83, %82 : vector<8x128xf32>
    %cst_26 = arith.constant 1.000000e+00 : f32
    %85 = vector.broadcast %cst_26 : f32 to vector<8x128xf32>
    %86 = arith.divf %85, %84 : vector<8x128xf32>
    %87 = arith.mulf %79, %86 : vector<8x128xf32>
    %c0_27 = arith.constant 0 : index
    %c0_28 = arith.constant 0 : index
    %88 = vector.load %arg7[%c0_27, %c0_28] : memref<128x128xf32, #tpu.memory_space<vmem>>, vector<128x128xf32>
    %cst_29 = arith.constant dense<0.000000e+00> : vector<8x128xf32>
    %89 = tpu.matmul %87, %88, %cst_29 {dimension_numbers = #tpu.dot_dimension_numbers<[1], [0], [0], [1], [0, 0, 1, 1], [], []>} : vector<8x128xf32>, vector<128x128xf32>, vector<8x128xf32> -> vector<8x128xf32>
    %c0_30 = arith.constant 0 : index
    %c0_31 = arith.constant 0 : index
    %90 = vector.load %arg8[%c0_30, %c0_31] : memref<1x128xf32, #tpu.memory_space<vmem>>, vector<1x128xf32>
    %91 = vector.broadcast %90 : vector<1x128xf32> to vector<8x128xf32>
    %92 = arith.addf %89, %91 : vector<8x128xf32>
    %cst_32 = arith.constant 0.000000e+00 : f32
    %93 = vector.broadcast %cst_32 : f32 to vector<8x128xf32>
    %94 = arith.maximumf %92, %93 : vector<8x128xf32>
    %95 = math.absf %92 : vector<8x128xf32>
    %cst_33 = arith.constant 0.000000e+00 : f32
    %96 = vector.broadcast %cst_33 : f32 to vector<8x128xf32>
    %97 = arith.subf %96, %95 : vector<8x128xf32>
    %98 = math.exp %97 : vector<8x128xf32>
    %99 = math.log1p %98 : vector<8x128xf32>
    %100 = arith.addf %94, %99 : vector<8x128xf32>
    %c0_34 = arith.constant 0 : index
    %c0_35 = arith.constant 0 : index
    %101 = vector.load %arg9[%c0_34, %c0_35] : memref<128x64xf32, #tpu.memory_space<vmem>>, vector<128x64xf32>
    %cst_36 = arith.constant dense<0.000000e+00> : vector<8x64xf32>
    %102 = tpu.matmul %87, %101, %cst_36 {dimension_numbers = #tpu.dot_dimension_numbers<[1], [0], [0], [1], [0, 0, 1, 1], [], []>} : vector<8x128xf32>, vector<128x64xf32>, vector<8x64xf32> -> vector<8x64xf32>
    %103 = vector.extract_strided_slice %102 {offsets = [0, 0], sizes = [8, 16], strides = [1, 1]} : vector<8x64xf32> to vector<8x16xf32>
    %104 = vector.extract_strided_slice %102 {offsets = [0, 16], sizes = [8, 16], strides = [1, 1]} : vector<8x64xf32> to vector<8x16xf32>
    %105 = vector.extract_strided_slice %102 {offsets = [0, 32], sizes = [8, 16], strides = [1, 1]} : vector<8x64xf32> to vector<8x16xf32>
    %106 = vector.extract_strided_slice %102 {offsets = [0, 48], sizes = [8, 16], strides = [1, 1]} : vector<8x64xf32> to vector<8x16xf32>
    %107 = tpu.iota {dimensions = array<i32: 2>} : vector<1x1x128xi32>
    %c64_i32 = arith.constant 64 : i32
    %108 = vector.broadcast %c64_i32 : i32 to vector<1x1x128xi32>
    %109 = arith.cmpi slt, %107, %108 : vector<1x1x128xi32>
    %110 = arith.extui %109 : vector<1x1x128xi1> to vector<1x1x128xi32>
    %111 = arith.sitofp %110 : vector<1x1x128xi32> to vector<1x1x128xf32>
    %cst_37 = arith.constant 1.000000e+00 : f32
    %112 = vector.broadcast %cst_37 : f32 to vector<1x1x128xf32>
    %113 = arith.subf %112, %111 : vector<1x1x128xf32>
    %114 = vector.shape_cast %103 : vector<8x16xf32> to vector<8x16x1xf32>
    %115 = vector.broadcast %114 : vector<8x16x1xf32> to vector<8x16x128xf32>
    %116 = vector.broadcast %111 : vector<1x1x128xf32> to vector<8x16x128xf32>
    %117 = arith.mulf %115, %116 : vector<8x16x128xf32>
    %118 = vector.shape_cast %104 : vector<8x16xf32> to vector<8x16x1xf32>
    %119 = vector.broadcast %118 : vector<8x16x1xf32> to vector<8x16x128xf32>
    %120 = vector.broadcast %113 : vector<1x1x128xf32> to vector<8x16x128xf32>
    %121 = arith.mulf %119, %120 : vector<8x16x128xf32>
    %122 = arith.addf %117, %121 : vector<8x16x128xf32>
    %c0_38 = arith.constant 0 : index
    %c0_39 = arith.constant 0 : index
    %c0_40 = arith.constant 0 : index
    %123 = vector.load %arg20[%c0_38, %c0_39, %c0_40] : memref<8x16x128xf32, #tpu.memory_space<vmem>>, vector<8x16x128xf32>
    tpu.vector_store %arg20[%c0_38, %c0_39, %c0_40], %122 {strides = array<i32>} : memref<8x16x128xf32, #tpu.memory_space<vmem>>, vector<8x16x128xf32>,
    %124 = vector.shape_cast %105 : vector<8x16xf32> to vector<8x16x1xf32>
    %125 = vector.broadcast %124 : vector<8x16x1xf32> to vector<8x16x128xf32>
    %126 = vector.broadcast %111 : vector<1x1x128xf32> to vector<8x16x128xf32>
    %127 = arith.mulf %125, %126 : vector<8x16x128xf32>
    %128 = vector.shape_cast %106 : vector<8x16xf32> to vector<8x16x1xf32>
    %129 = vector.broadcast %128 : vector<8x16x1xf32> to vector<8x16x128xf32>
    %130 = vector.broadcast %113 : vector<1x1x128xf32> to vector<8x16x128xf32>
    %131 = arith.mulf %129, %130 : vector<8x16x128xf32>
    %132 = arith.addf %127, %131 : vector<8x16x128xf32>
    %c0_41 = arith.constant 0 : index
    %c0_42 = arith.constant 0 : index
    %c0_43 = arith.constant 0 : index
    %133 = vector.load %arg21[%c0_41, %c0_42, %c0_43] : memref<8x16x128xf32, #tpu.memory_space<vmem>>, vector<8x16x128xf32>
    tpu.vector_store %arg21[%c0_41, %c0_42, %c0_43], %132 {strides = array<i32>} : memref<8x16x128xf32, #tpu.memory_space<vmem>>, vector<8x16x128xf32>,
    %134 = arith.mulf %100, %87 : vector<8x128xf32>
    %c0_44 = arith.constant 0 : index
    %c0_45 = arith.constant 0 : index
    %135 = vector.load %arg10[%c0_44, %c0_45] : memref<16x128xf32, #tpu.memory_space<vmem>>, vector<16x128xf32>
    %cst_46 = arith.constant 0.000000e+00 : f32
    %136 = vector.broadcast %cst_46 : f32 to vector<16x128xf32>
    %137 = vector.extract_strided_slice %100 {offsets = [0, 0], sizes = [1, 128], strides = [1, 1]} : vector<8x128xf32> to vector<1x128xf32>
    %138 = vector.broadcast %137 : vector<1x128xf32> to vector<16x128xf32>
    %139 = arith.mulf %138, %135 : vector<16x128xf32>
    %140 = math.exp %139 : vector<16x128xf32>
    %141 = arith.mulf %140, %136 : vector<16x128xf32>
    %142 = vector.extract_strided_slice %134 {offsets = [0, 0], sizes = [1, 128], strides = [1, 1]} : vector<8x128xf32> to vector<1x128xf32>
    %c0_47 = arith.constant 0 : index
    %c0_48 = arith.constant 0 : index
    %c0_49 = arith.constant 0 : index
    %143 = vector.load %arg20[%c0_47, %c0_48, %c0_49] : memref<8x16x128xf32, #tpu.memory_space<vmem>>, vector<1x16x128xf32>
    %144 = vector.shape_cast %143 : vector<1x16x128xf32> to vector<16x128xf32>
    %145 = vector.broadcast %142 : vector<1x128xf32> to vector<16x128xf32>
    %146 = arith.mulf %145, %144 : vector<16x128xf32>
    %147 = arith.addf %141, %146 : vector<16x128xf32>
    %c0_50 = arith.constant 0 : index
    %c0_51 = arith.constant 0 : index
    %c0_52 = arith.constant 0 : index
    %148 = vector.load %arg21[%c0_50, %c0_51, %c0_52] : memref<8x16x128xf32, #tpu.memory_space<vmem>>, vector<1x16x128xf32>
    %149 = vector.shape_cast %148 : vector<1x16x128xf32> to vector<16x128xf32>
    %150 = arith.mulf %147, %149 : vector<16x128xf32>
    %cst_53 = arith.constant dense<0.000000e+00> : vector<128xf32>
    %151 = vector.multi_reduction <add>, %150, %cst_53 [0] : vector<16x128xf32> to vector<128xf32>
    %c0_54 = arith.constant 0 : index
    %c0_55 = arith.constant 0 : index
    %152 = vector.load %arg22[%c0_54, %c0_55] : memref<8x128xf32, #tpu.memory_space<vmem>>, vector<1x128xf32>
    %153 = vector.shape_cast %152 : vector<1x128xf32> to vector<128xf32>
    %154 = vector.shape_cast %151 : vector<128xf32> to vector<1x128xf32>
    tpu.vector_store %arg22[%c0_54, %c0_55], %154 {strides = array<i32>} : memref<8x128xf32, #tpu.memory_space<vmem>>, vector<1x128xf32>,
    %155 = vector.extract_strided_slice %100 {offsets = [1, 0], sizes = [1, 128], strides = [1, 1]} : vector<8x128xf32> to vector<1x128xf32>
    %156 = vector.broadcast %155 : vector<1x128xf32> to vector<16x128xf32>
    %157 = arith.mulf %156, %135 : vector<16x128xf32>
    %158 = math.exp %157 : vector<16x128xf32>
    %159 = arith.mulf %158, %147 : vector<16x128xf32>
    %160 = vector.extract_strided_slice %134 {offsets = [1, 0], sizes = [1, 128], strides = [1, 1]} : vector<8x128xf32> to vector<1x128xf32>
    %c1 = arith.constant 1 : index
    %c0_56 = arith.constant 0 : index
    %c0_57 = arith.constant 0 : index
    %161 = vector.load %arg20[%c1, %c0_56, %c0_57] : memref<8x16x128xf32, #tpu.memory_space<vmem>>, vector<1x16x128xf32>
    %162 = vector.shape_cast %161 : vector<1x16x128xf32> to vector<16x128xf32>
    %163 = vector.broadcast %160 : vector<1x128xf32> to vector<16x128xf32>
    %164 = arith.mulf %163, %162 : vector<16x128xf32>
    %165 = arith.addf %159, %164 : vector<16x128xf32>
    %c1_58 = arith.constant 1 : index
    %c0_59 = arith.constant 0 : index
    %c0_60 = arith.constant 0 : index
    %166 = vector.load %arg21[%c1_58, %c0_59, %c0_60] : memref<8x16x128xf32, #tpu.memory_space<vmem>>, vector<1x16x128xf32>
    %167 = vector.shape_cast %166 : vector<1x16x128xf32> to vector<16x128xf32>
    %168 = arith.mulf %165, %167 : vector<16x128xf32>
    %cst_61 = arith.constant dense<0.000000e+00> : vector<128xf32>
    %169 = vector.multi_reduction <add>, %168, %cst_61 [0] : vector<16x128xf32> to vector<128xf32>
    %c1_62 = arith.constant 1 : index
    %c0_63 = arith.constant 0 : index
    %170 = vector.load %arg22[%c1_62, %c0_63] : memref<8x128xf32, #tpu.memory_space<vmem>>, vector<1x128xf32>
    %171 = vector.shape_cast %170 : vector<1x128xf32> to vector<128xf32>
    %172 = vector.shape_cast %169 : vector<128xf32> to vector<1x128xf32>
    tpu.vector_store %arg22[%c1_62, %c0_63], %172 {strides = array<i32>} : memref<8x128xf32, #tpu.memory_space<vmem>>, vector<1x128xf32>,
    %173 = vector.extract_strided_slice %100 {offsets = [2, 0], sizes = [1, 128], strides = [1, 1]} : vector<8x128xf32> to vector<1x128xf32>
    %174 = vector.broadcast %173 : vector<1x128xf32> to vector<16x128xf32>
    %175 = arith.mulf %174, %135 : vector<16x128xf32>
    %176 = math.exp %175 : vector<16x128xf32>
    %177 = arith.mulf %176, %165 : vector<16x128xf32>
    %178 = vector.extract_strided_slice %134 {offsets = [2, 0], sizes = [1, 128], strides = [1, 1]} : vector<8x128xf32> to vector<1x128xf32>
    %c2 = arith.constant 2 : index
    %c0_64 = arith.constant 0 : index
    %c0_65 = arith.constant 0 : index
    %179 = vector.load %arg20[%c2, %c0_64, %c0_65] : memref<8x16x128xf32, #tpu.memory_space<vmem>>, vector<1x16x128xf32>
    %180 = vector.shape_cast %179 : vector<1x16x128xf32> to vector<16x128xf32>
    %181 = vector.broadcast %178 : vector<1x128xf32> to vector<16x128xf32>
    %182 = arith.mulf %181, %180 : vector<16x128xf32>
    %183 = arith.addf %177, %182 : vector<16x128xf32>
    %c2_66 = arith.constant 2 : index
    %c0_67 = arith.constant 0 : index
    %c0_68 = arith.constant 0 : index
    %184 = vector.load %arg21[%c2_66, %c0_67, %c0_68] : memref<8x16x128xf32, #tpu.memory_space<vmem>>, vector<1x16x128xf32>
    %185 = vector.shape_cast %184 : vector<1x16x128xf32> to vector<16x128xf32>
    %186 = arith.mulf %183, %185 : vector<16x128xf32>
    %cst_69 = arith.constant dense<0.000000e+00> : vector<128xf32>
    %187 = vector.multi_reduction <add>, %186, %cst_69 [0] : vector<16x128xf32> to vector<128xf32>
    %c2_70 = arith.constant 2 : index
    %c0_71 = arith.constant 0 : index
    %188 = vector.load %arg22[%c2_70, %c0_71] : memref<8x128xf32, #tpu.memory_space<vmem>>, vector<1x128xf32>
    %189 = vector.shape_cast %188 : vector<1x128xf32> to vector<128xf32>
    %190 = vector.shape_cast %187 : vector<128xf32> to vector<1x128xf32>
    tpu.vector_store %arg22[%c2_70, %c0_71], %190 {strides = array<i32>} : memref<8x128xf32, #tpu.memory_space<vmem>>, vector<1x128xf32>,
    %191 = vector.extract_strided_slice %100 {offsets = [3, 0], sizes = [1, 128], strides = [1, 1]} : vector<8x128xf32> to vector<1x128xf32>
    %192 = vector.broadcast %191 : vector<1x128xf32> to vector<16x128xf32>
    %193 = arith.mulf %192, %135 : vector<16x128xf32>
    %194 = math.exp %193 : vector<16x128xf32>
    %195 = arith.mulf %194, %183 : vector<16x128xf32>
    %196 = vector.extract_strided_slice %134 {offsets = [3, 0], sizes = [1, 128], strides = [1, 1]} : vector<8x128xf32> to vector<1x128xf32>
    %c3 = arith.constant 3 : index
    %c0_72 = arith.constant 0 : index
    %c0_73 = arith.constant 0 : index
    %197 = vector.load %arg20[%c3, %c0_72, %c0_73] : memref<8x16x128xf32, #tpu.memory_space<vmem>>, vector<1x16x128xf32>
    %198 = vector.shape_cast %197 : vector<1x16x128xf32> to vector<16x128xf32>
    %199 = vector.broadcast %196 : vector<1x128xf32> to vector<16x128xf32>
    %200 = arith.mulf %199, %198 : vector<16x128xf32>
    %201 = arith.addf %195, %200 : vector<16x128xf32>
    %c3_74 = arith.constant 3 : index
    %c0_75 = arith.constant 0 : index
    %c0_76 = arith.constant 0 : index
    %202 = vector.load %arg21[%c3_74, %c0_75, %c0_76] : memref<8x16x128xf32, #tpu.memory_space<vmem>>, vector<1x16x128xf32>
    %203 = vector.shape_cast %202 : vector<1x16x128xf32> to vector<16x128xf32>
    %204 = arith.mulf %201, %203 : vector<16x128xf32>
    %cst_77 = arith.constant dense<0.000000e+00> : vector<128xf32>
    %205 = vector.multi_reduction <add>, %204, %cst_77 [0] : vector<16x128xf32> to vector<128xf32>
    %c3_78 = arith.constant 3 : index
    %c0_79 = arith.constant 0 : index
    %206 = vector.load %arg22[%c3_78, %c0_79] : memref<8x128xf32, #tpu.memory_space<vmem>>, vector<1x128xf32>
    %207 = vector.shape_cast %206 : vector<1x128xf32> to vector<128xf32>
    %208 = vector.shape_cast %205 : vector<128xf32> to vector<1x128xf32>
    tpu.vector_store %arg22[%c3_78, %c0_79], %208 {strides = array<i32>} : memref<8x128xf32, #tpu.memory_space<vmem>>, vector<1x128xf32>,
    %209 = vector.extract_strided_slice %100 {offsets = [4, 0], sizes = [1, 128], strides = [1, 1]} : vector<8x128xf32> to vector<1x128xf32>
    %210 = vector.broadcast %209 : vector<1x128xf32> to vector<16x128xf32>
    %211 = arith.mulf %210, %135 : vector<16x128xf32>
    %212 = math.exp %211 : vector<16x128xf32>
    %213 = arith.mulf %212, %201 : vector<16x128xf32>
    %214 = vector.extract_strided_slice %134 {offsets = [4, 0], sizes = [1, 128], strides = [1, 1]} : vector<8x128xf32> to vector<1x128xf32>
    %c4 = arith.constant 4 : index
    %c0_80 = arith.constant 0 : index
    %c0_81 = arith.constant 0 : index
    %215 = vector.load %arg20[%c4, %c0_80, %c0_81] : memref<8x16x128xf32, #tpu.memory_space<vmem>>, vector<1x16x128xf32>
    %216 = vector.shape_cast %215 : vector<1x16x128xf32> to vector<16x128xf32>
    %217 = vector.broadcast %214 : vector<1x128xf32> to vector<16x128xf32>
    %218 = arith.mulf %217, %216 : vector<16x128xf32>
    %219 = arith.addf %213, %218 : vector<16x128xf32>
    %c4_82 = arith.constant 4 : index
    %c0_83 = arith.constant 0 : index
    %c0_84 = arith.constant 0 : index
    %220 = vector.load %arg21[%c4_82, %c0_83, %c0_84] : memref<8x16x128xf32, #tpu.memory_space<vmem>>, vector<1x16x128xf32>
    %221 = vector.shape_cast %220 : vector<1x16x128xf32> to vector<16x128xf32>
    %222 = arith.mulf %219, %221 : vector<16x128xf32>
    %cst_85 = arith.constant dense<0.000000e+00> : vector<128xf32>
    %223 = vector.multi_reduction <add>, %222, %cst_85 [0] : vector<16x128xf32> to vector<128xf32>
    %c4_86 = arith.constant 4 : index
    %c0_87 = arith.constant 0 : index
    %224 = vector.load %arg22[%c4_86, %c0_87] : memref<8x128xf32, #tpu.memory_space<vmem>>, vector<1x128xf32>
    %225 = vector.shape_cast %224 : vector<1x128xf32> to vector<128xf32>
    %226 = vector.shape_cast %223 : vector<128xf32> to vector<1x128xf32>
    tpu.vector_store %arg22[%c4_86, %c0_87], %226 {strides = array<i32>} : memref<8x128xf32, #tpu.memory_space<vmem>>, vector<1x128xf32>,
    %227 = vector.extract_strided_slice %100 {offsets = [5, 0], sizes = [1, 128], strides = [1, 1]} : vector<8x128xf32> to vector<1x128xf32>
    %228 = vector.broadcast %227 : vector<1x128xf32> to vector<16x128xf32>
    %229 = arith.mulf %228, %135 : vector<16x128xf32>
    %230 = math.exp %229 : vector<16x128xf32>
    %231 = arith.mulf %230, %219 : vector<16x128xf32>
    %232 = vector.extract_strided_slice %134 {offsets = [5, 0], sizes = [1, 128], strides = [1, 1]} : vector<8x128xf32> to vector<1x128xf32>
    %c5 = arith.constant 5 : index
    %c0_88 = arith.constant 0 : index
    %c0_89 = arith.constant 0 : index
    %233 = vector.load %arg20[%c5, %c0_88, %c0_89] : memref<8x16x128xf32, #tpu.memory_space<vmem>>, vector<1x16x128xf32>
    %234 = vector.shape_cast %233 : vector<1x16x128xf32> to vector<16x128xf32>
    %235 = vector.broadcast %232 : vector<1x128xf32> to vector<16x128xf32>
    %236 = arith.mulf %235, %234 : vector<16x128xf32>
    %237 = arith.addf %231, %236 : vector<16x128xf32>
    %c5_90 = arith.constant 5 : index
    %c0_91 = arith.constant 0 : index
    %c0_92 = arith.constant 0 : index
    %238 = vector.load %arg21[%c5_90, %c0_91, %c0_92] : memref<8x16x128xf32, #tpu.memory_space<vmem>>, vector<1x16x128xf32>
    %239 = vector.shape_cast %238 : vector<1x16x128xf32> to vector<16x128xf32>
    %240 = arith.mulf %237, %239 : vector<16x128xf32>
    %cst_93 = arith.constant dense<0.000000e+00> : vector<128xf32>
    %241 = vector.multi_reduction <add>, %240, %cst_93 [0] : vector<16x128xf32> to vector<128xf32>
    %c5_94 = arith.constant 5 : index
    %c0_95 = arith.constant 0 : index
    %242 = vector.load %arg22[%c5_94, %c0_95] : memref<8x128xf32, #tpu.memory_space<vmem>>, vector<1x128xf32>
    %243 = vector.shape_cast %242 : vector<1x128xf32> to vector<128xf32>
    %244 = vector.shape_cast %241 : vector<128xf32> to vector<1x128xf32>
    tpu.vector_store %arg22[%c5_94, %c0_95], %244 {strides = array<i32>} : memref<8x128xf32, #tpu.memory_space<vmem>>, vector<1x128xf32>,
    %245 = vector.extract_strided_slice %100 {offsets = [6, 0], sizes = [1, 128], strides = [1, 1]} : vector<8x128xf32> to vector<1x128xf32>
    %246 = vector.broadcast %245 : vector<1x128xf32> to vector<16x128xf32>
    %247 = arith.mulf %246, %135 : vector<16x128xf32>
    %248 = math.exp %247 : vector<16x128xf32>
    %249 = arith.mulf %248, %237 : vector<16x128xf32>
    %250 = vector.extract_strided_slice %134 {offsets = [6, 0], sizes = [1, 128], strides = [1, 1]} : vector<8x128xf32> to vector<1x128xf32>
    %c6 = arith.constant 6 : index
    %c0_96 = arith.constant 0 : index
    %c0_97 = arith.constant 0 : index
    %251 = vector.load %arg20[%c6, %c0_96, %c0_97] : memref<8x16x128xf32, #tpu.memory_space<vmem>>, vector<1x16x128xf32>
    %252 = vector.shape_cast %251 : vector<1x16x128xf32> to vector<16x128xf32>
    %253 = vector.broadcast %250 : vector<1x128xf32> to vector<16x128xf32>
    %254 = arith.mulf %253, %252 : vector<16x128xf32>
    %255 = arith.addf %249, %254 : vector<16x128xf32>
    %c6_98 = arith.constant 6 : index
    %c0_99 = arith.constant 0 : index
    %c0_100 = arith.constant 0 : index
    %256 = vector.load %arg21[%c6_98, %c0_99, %c0_100] : memref<8x16x128xf32, #tpu.memory_space<vmem>>, vector<1x16x128xf32>
    %257 = vector.shape_cast %256 : vector<1x16x128xf32> to vector<16x128xf32>
    %258 = arith.mulf %255, %257 : vector<16x128xf32>
    %cst_101 = arith.constant dense<0.000000e+00> : vector<128xf32>
    %259 = vector.multi_reduction <add>, %258, %cst_101 [0] : vector<16x128xf32> to vector<128xf32>
    %c6_102 = arith.constant 6 : index
    %c0_103 = arith.constant 0 : index
    %260 = vector.load %arg22[%c6_102, %c0_103] : memref<8x128xf32, #tpu.memory_space<vmem>>, vector<1x128xf32>
    %261 = vector.shape_cast %260 : vector<1x128xf32> to vector<128xf32>
    %262 = vector.shape_cast %259 : vector<128xf32> to vector<1x128xf32>
    tpu.vector_store %arg22[%c6_102, %c0_103], %262 {strides = array<i32>} : memref<8x128xf32, #tpu.memory_space<vmem>>, vector<1x128xf32>,
    %263 = vector.extract_strided_slice %100 {offsets = [7, 0], sizes = [1, 128], strides = [1, 1]} : vector<8x128xf32> to vector<1x128xf32>
    %264 = vector.broadcast %263 : vector<1x128xf32> to vector<16x128xf32>
    %265 = arith.mulf %264, %135 : vector<16x128xf32>
    %266 = math.exp %265 : vector<16x128xf32>
    %267 = arith.mulf %266, %255 : vector<16x128xf32>
    %268 = vector.extract_strided_slice %134 {offsets = [7, 0], sizes = [1, 128], strides = [1, 1]} : vector<8x128xf32> to vector<1x128xf32>
    %c7 = arith.constant 7 : index
    %c0_104 = arith.constant 0 : index
    %c0_105 = arith.constant 0 : index
    %269 = vector.load %arg20[%c7, %c0_104, %c0_105] : memref<8x16x128xf32, #tpu.memory_space<vmem>>, vector<1x16x128xf32>
    %270 = vector.shape_cast %269 : vector<1x16x128xf32> to vector<16x128xf32>
    %271 = vector.broadcast %268 : vector<1x128xf32> to vector<16x128xf32>
    %272 = arith.mulf %271, %270 : vector<16x128xf32>
    %273 = arith.addf %267, %272 : vector<16x128xf32>
    %c7_106 = arith.constant 7 : index
    %c0_107 = arith.constant 0 : index
    %c0_108 = arith.constant 0 : index
    %274 = vector.load %arg21[%c7_106, %c0_107, %c0_108] : memref<8x16x128xf32, #tpu.memory_space<vmem>>, vector<1x16x128xf32>
    %275 = vector.shape_cast %274 : vector<1x16x128xf32> to vector<16x128xf32>
    %276 = arith.mulf %273, %275 : vector<16x128xf32>
    %cst_109 = arith.constant dense<0.000000e+00> : vector<128xf32>
    %277 = vector.multi_reduction <add>, %276, %cst_109 [0] : vector<16x128xf32> to vector<128xf32>
    %c7_110 = arith.constant 7 : index
    %c0_111 = arith.constant 0 : index
    %278 = vector.load %arg22[%c7_110, %c0_111] : memref<8x128xf32, #tpu.memory_space<vmem>>, vector<1x128xf32>
    %279 = vector.shape_cast %278 : vector<1x128xf32> to vector<128xf32>
    %280 = vector.shape_cast %277 : vector<128xf32> to vector<1x128xf32>
    tpu.vector_store %arg22[%c7_110, %c0_111], %280 {strides = array<i32>} : memref<8x128xf32, #tpu.memory_space<vmem>>, vector<1x128xf32>,
    %c0_112 = arith.constant 0 : index
    %c0_113 = arith.constant 0 : index
    %281 = vector.load %arg22[%c0_112, %c0_113] : memref<8x128xf32, #tpu.memory_space<vmem>>, vector<8x128xf32>
    %c0_114 = arith.constant 0 : index
    %c0_115 = arith.constant 0 : index
    %282 = vector.load %arg11[%c0_114, %c0_115] : memref<1x128xf32, #tpu.memory_space<vmem>>, vector<1x128xf32>
    %283 = vector.broadcast %282 : vector<1x128xf32> to vector<8x128xf32>
    %284 = arith.mulf %87, %283 : vector<8x128xf32>
    %285 = arith.addf %281, %284 : vector<8x128xf32>
    %cst_116 = arith.constant 0.000000e+00 : f32
    %286 = vector.broadcast %cst_116 : f32 to vector<8x128xf32>
    %287 = arith.subf %286, %38 : vector<8x128xf32>
    %288 = math.exp %287 : vector<8x128xf32>
    %cst_117 = arith.constant 1.000000e+00 : f32
    %289 = vector.broadcast %cst_117 : f32 to vector<8x128xf32>
    %290 = arith.addf %289, %288 : vector<8x128xf32>
    %cst_118 = arith.constant 1.000000e+00 : f32
    %291 = vector.broadcast %cst_118 : f32 to vector<8x128xf32>
    %292 = arith.divf %291, %290 : vector<8x128xf32>
    %293 = arith.mulf %38, %292 : vector<8x128xf32>
    %294 = arith.mulf %285, %293 : vector<8x128xf32>
    %c0_119 = arith.constant 0 : index
    %c0_120 = arith.constant 0 : index
    %295 = vector.load %arg12[%c0_119, %c0_120] : memref<128x32xf32, #tpu.memory_space<vmem>>, vector<128x32xf32>
    %cst_121 = arith.constant dense<0.000000e+00> : vector<8x32xf32>
    %296 = tpu.matmul %294, %295, %cst_121 {dimension_numbers = #tpu.dot_dimension_numbers<[1], [0], [0], [1], [0, 0, 1, 1], [], []>} : vector<8x128xf32>, vector<128x32xf32>, vector<8x32xf32> -> vector<8x32xf32>
    %297 = arith.addf %296, %1 : vector<8x32xf32>
    %cst_122 = arith.constant 5.000000e-01 : f32
    %298 = vector.broadcast %cst_122 : f32 to vector<8x32xf32>
    %299 = arith.mulf %298, %297 : vector<8x32xf32>
    %cst_123 = arith.constant 0.707106769 : f32
    %300 = vector.broadcast %cst_123 : f32 to vector<8x32xf32>
    %301 = arith.mulf %297, %300 : vector<8x32xf32>
    %302 = math.erf %301 : vector<8x32xf32>
    %cst_124 = arith.constant 1.000000e+00 : f32
    %303 = vector.broadcast %cst_124 : f32 to vector<8x32xf32>
    %304 = arith.addf %303, %302 : vector<8x32xf32>
    %305 = arith.mulf %299, %304 : vector<8x32xf32>
    %306 = arith.addf %1, %305 : vector<8x32xf32>
    %c0_125 = arith.constant 0 : index
    %c0_126 = arith.constant 0 : index
    %307 = vector.load %arg13[%c0_125, %c0_126] : memref<1x32xf32, #tpu.memory_space<vmem>>, vector<1x32xf32>
    %c0_127 = arith.constant 0 : index
    %c0_128 = arith.constant 0 : index
    %308 = vector.load %arg14[%c0_127, %c0_128] : memref<1x32xf32, #tpu.memory_space<vmem>>, vector<1x32xf32>
    %cst_129 = arith.constant dense<0.000000e+00> : vector<8xf32>
    %309 = vector.multi_reduction <add>, %306, %cst_129 [1] : vector<8x32xf32> to vector<8xf32>
    %310 = vector.shape_cast %309 : vector<8xf32> to vector<8x1xf32>
    %cst_130 = arith.constant 3.200000e+01 : f32
    %311 = vector.broadcast %cst_130 : f32 to vector<8x1xf32>
    %312 = arith.divf %310, %311 : vector<8x1xf32>
    %313 = vector.broadcast %312 : vector<8x1xf32> to vector<8x32xf32>
    %314 = arith.subf %306, %313 : vector<8x32xf32>
    %315 = arith.mulf %314, %314 : vector<8x32xf32>
    %cst_131 = arith.constant dense<0.000000e+00> : vector<8xf32>
    %316 = vector.multi_reduction <add>, %315, %cst_131 [1] : vector<8x32xf32> to vector<8xf32>
    %317 = vector.shape_cast %316 : vector<8xf32> to vector<8x1xf32>
    %cst_132 = arith.constant 3.200000e+01 : f32
    %318 = vector.broadcast %cst_132 : f32 to vector<8x1xf32>
    %319 = arith.divf %317, %318 : vector<8x1xf32>
    %320 = vector.broadcast %312 : vector<8x1xf32> to vector<8x32xf32>
    %321 = arith.subf %306, %320 : vector<8x32xf32>
    %cst_133 = arith.constant 9.99999974E-6 : f32
    %322 = vector.broadcast %cst_133 : f32 to vector<8x1xf32>
    %323 = arith.addf %319, %322 : vector<8x1xf32>
    %324 = math.rsqrt %323 : vector<8x1xf32>
    %325 = vector.broadcast %324 : vector<8x1xf32> to vector<8x32xf32>
    %326 = arith.mulf %321, %325 : vector<8x32xf32>
    %327 = vector.broadcast %307 : vector<1x32xf32> to vector<8x32xf32>
    %328 = arith.mulf %326, %327 : vector<8x32xf32>
    %329 = vector.broadcast %308 : vector<1x32xf32> to vector<8x32xf32>
    %330 = arith.addf %328, %329 : vector<8x32xf32>
    %c0_134 = arith.constant 0 : index
    %c0_135 = arith.constant 0 : index
    %331 = vector.load %arg15[%c0_134, %c0_135] : memref<32x128xf32, #tpu.memory_space<vmem>>, vector<32x128xf32>
    %cst_136 = arith.constant dense<0.000000e+00> : vector<8x128xf32>
    %332 = tpu.matmul %330, %331, %cst_136 {dimension_numbers = #tpu.dot_dimension_numbers<[1], [0], [0], [1], [0, 0, 1, 1], [], []>} : vector<8x32xf32>, vector<32x128xf32>, vector<8x128xf32> -> vector<8x128xf32>
    %c0_137 = arith.constant 0 : index
    %c0_138 = arith.constant 0 : index
    %333 = vector.load %arg16[%c0_137, %c0_138] : memref<1x128xf32, #tpu.memory_space<vmem>>, vector<1x128xf32>
    %334 = vector.broadcast %333 : vector<1x128xf32> to vector<8x128xf32>
    %335 = arith.addf %332, %334 : vector<8x128xf32>
    %cst_139 = arith.constant 5.000000e-01 : f32
    %336 = vector.broadcast %cst_139 : f32 to vector<8x128xf32>
    %337 = arith.mulf %336, %335 : vector<8x128xf32>
    %cst_140 = arith.constant 0.707106769 : f32
    %338 = vector.broadcast %cst_140 : f32 to vector<8x128xf32>
    %339 = arith.mulf %335, %338 : vector<8x128xf32>
    %340 = math.erf %339 : vector<8x128xf32>
    %cst_141 = arith.constant 1.000000e+00 : f32
    %341 = vector.broadcast %cst_141 : f32 to vector<8x128xf32>
    %342 = arith.addf %341, %340 : vector<8x128xf32>
    %343 = arith.mulf %337, %342 : vector<8x128xf32>
    %c0_142 = arith.constant 0 : index
    %c0_143 = arith.constant 0 : index
    %344 = vector.load %arg17[%c0_142, %c0_143] : memref<128x32xf32, #tpu.memory_space<vmem>>, vector<128x32xf32>
    %cst_144 = arith.constant dense<0.000000e+00> : vector<8x32xf32>
    %345 = tpu.matmul %343, %344, %cst_144 {dimension_numbers = #tpu.dot_dimension_numbers<[1], [0], [0], [1], [0, 0, 1, 1], [], []>} : vector<8x128xf32>, vector<128x32xf32>, vector<8x32xf32> -> vector<8x32xf32>
    %c0_145 = arith.constant 0 : index
    %c0_146 = arith.constant 0 : index
    %346 = vector.load %arg18[%c0_145, %c0_146] : memref<1x32xf32, #tpu.memory_space<vmem>>, vector<1x32xf32>
    %347 = vector.broadcast %346 : vector<1x32xf32> to vector<8x32xf32>
    %348 = arith.addf %345, %347 : vector<8x32xf32>
    %349 = arith.addf %306, %348 : vector<8x32xf32>
    %c0_147 = arith.constant 0 : index
    %c0_148 = arith.constant 0 : index
    %c0_149 = arith.constant 0 : index
    %350 = vector.load %arg19[%c0_147, %c0_148, %c0_149] : memref<1x8x32xf32, #tpu.memory_space<vmem>>, vector<1x8x32xf32>
    %351 = vector.shape_cast %350 : vector<1x8x32xf32> to vector<8x32xf32>
    %352 = vector.shape_cast %349 : vector<8x32xf32> to vector<1x8x32xf32>
    tpu.vector_store %arg19[%c0_147, %c0_148, %c0_149], %352 {strides = array<i32>} : memref<1x8x32xf32, #tpu.memory_space<vmem>>, vector<1x8x32xf32>,
    return
  }
  func.func @transform_0(%arg0: i32) -> (i32, i32, i32) {
    %c0_i32 = arith.constant 0 : i32
    %c0_i32_0 = arith.constant 0 : i32
    %c0_i32_1 = arith.constant 0 : i32
    return %arg0, %c0_i32, %c0_i32_0 : i32, i32, i32
  }
  func.func @transform_1(%arg0: i32) -> (i32, i32) {
    %c0_i32 = arith.constant 0 : i32
    %c0_i32_0 = arith.constant 0 : i32
    %c0_i32_1 = arith.constant 0 : i32
    return %c0_i32, %c0_i32_0 : i32, i32
  }
  func.func @transform_2(%arg0: i32) -> (i32, i32) {
    %c0_i32 = arith.constant 0 : i32
    %c0_i32_0 = arith.constant 0 : i32
    %c0_i32_1 = arith.constant 0 : i32
    return %c0_i32, %c0_i32_0 : i32, i32
  }
  func.func @transform_3(%arg0: i32) -> (i32, i32) {
    %c0_i32 = arith.constant 0 : i32
    %c0_i32_0 = arith.constant 0 : i32
    %c0_i32_1 = arith.constant 0 : i32
    return %c0_i32, %c0_i32_0 : i32, i32
  }
  func.func @transform_4(%arg0: i32) -> (i32, i32) {
    %c0_i32 = arith.constant 0 : i32
    %c0_i32_0 = arith.constant 0 : i32
    %c0_i32_1 = arith.constant 0 : i32
    return %c0_i32, %c0_i32_0 : i32, i32
  }
  func.func @transform_5(%arg0: i32) -> (i32, i32) {
    %c0_i32 = arith.constant 0 : i32
    %c0_i32_0 = arith.constant 0 : i32
    %c0_i32_1 = arith.constant 0 : i32
    return %c0_i32, %c0_i32_0 : i32, i32
  }
  func.func @transform_6(%arg0: i32) -> (i32, i32) {
    %c0_i32 = arith.constant 0 : i32
    %c0_i32_0 = arith.constant 0 : i32
    %c0_i32_1 = arith.constant 0 : i32
    return %c0_i32, %c0_i32_0 : i32, i32
  }
  func.func @transform_7(%arg0: i32) -> (i32, i32) {
    %c0_i32 = arith.constant 0 : i32
    %c0_i32_0 = arith.constant 0 : i32
    %c0_i32_1 = arith.constant 0 : i32
    return %c0_i32, %c0_i32_0 : i32, i32
  }
  func.func @transform_8(%arg0: i32) -> (i32, i32) {
    %c0_i32 = arith.constant 0 : i32
    %c0_i32_0 = arith.constant 0 : i32
    %c0_i32_1 = arith.constant 0 : i32
    return %c0_i32, %c0_i32_0 : i32, i32
  }
  func.func @transform_9(%arg0: i32) -> (i32, i32) {
    %c0_i32 = arith.constant 0 : i32
    %c0_i32_0 = arith.constant 0 : i32
    %c0_i32_1 = arith.constant 0 : i32
    return %c0_i32, %c0_i32_0 : i32, i32
  }
  func.func @transform_10(%arg0: i32) -> (i32, i32) {
    %c0_i32 = arith.constant 0 : i32
    %c0_i32_0 = arith.constant 0 : i32
    %c0_i32_1 = arith.constant 0 : i32
    return %c0_i32, %c0_i32_0 : i32, i32
  }
  func.func @transform_11(%arg0: i32) -> (i32, i32) {
    %c0_i32 = arith.constant 0 : i32
    %c0_i32_0 = arith.constant 0 : i32
    %c0_i32_1 = arith.constant 0 : i32
    return %c0_i32, %c0_i32_0 : i32, i32
  }
  func.func @transform_12(%arg0: i32) -> (i32, i32) {
    %c0_i32 = arith.constant 0 : i32
    %c0_i32_0 = arith.constant 0 : i32
    %c0_i32_1 = arith.constant 0 : i32
    return %c0_i32, %c0_i32_0 : i32, i32
  }
  func.func @transform_13(%arg0: i32) -> (i32, i32) {
    %c0_i32 = arith.constant 0 : i32
    %c0_i32_0 = arith.constant 0 : i32
    %c0_i32_1 = arith.constant 0 : i32
    return %c0_i32, %c0_i32_0 : i32, i32
  }
  func.func @transform_14(%arg0: i32) -> (i32, i32) {
    %c0_i32 = arith.constant 0 : i32
    %c0_i32_0 = arith.constant 0 : i32
    %c0_i32_1 = arith.constant 0 : i32
    return %c0_i32, %c0_i32_0 : i32, i32
  }
  func.func @transform_15(%arg0: i32) -> (i32, i32) {
    %c0_i32 = arith.constant 0 : i32
    %c0_i32_0 = arith.constant 0 : i32
    %c0_i32_1 = arith.constant 0 : i32
    return %c0_i32, %c0_i32_0 : i32, i32
  }
  func.func @transform_16(%arg0: i32) -> (i32, i32) {
    %c0_i32 = arith.constant 0 : i32
    %c0_i32_0 = arith.constant 0 : i32
    %c0_i32_1 = arith.constant 0 : i32
    return %c0_i32, %c0_i32_0 : i32, i32
  }
  func.func @transform_17(%arg0: i32) -> (i32, i32) {
    %c0_i32 = arith.constant 0 : i32
    %c0_i32_0 = arith.constant 0 : i32
    %c0_i32_1 = arith.constant 0 : i32
    return %c0_i32, %c0_i32_0 : i32, i32
  }
  func.func @transform_18(%arg0: i32) -> (i32, i32, i32) {
    %c0_i32 = arith.constant 0 : i32
    %c0_i32_0 = arith.constant 0 : i32
    %c0_i32_1 = arith.constant 0 : i32
    return %arg0, %c0_i32, %c0_i32_0 : i32, i32, i32
  }
}

</mosaic_0001>

<bundles_post_ra>
// kernel: bidirectional_add_ff_block.1
= control target key start
LH: loop header
LB: loop body
LE: loop exit
PB: predicated region body
PF: predicated region fallthrough
CT: control target
= control target key end

     0   :  { %s3486_s0 = inlined_call_operand.vmem [shape: f32[2,8,32], index: 0, kind: input, shape index: {}]   ;;  %s3487_s1 = inlined_call_operand.vmem [shape: f32[1,32], index: 1, kind: input, shape index: {}]   ;;  %s3488_s2 = inlined_call_operand.vmem [shape: f32[1,32], index: 2, kind: input, shape index: {}]   ;;  %s3489_s3 = inlined_call_operand.vmem [shape: f32[64,256], index: 3, kind: input, shape index: {}]   ;;  %s3490_s4 = inlined_call_operand.vmem [shape: f32[4,128], index: 4, kind: input, shape index: {}]   ;;  %s3491_s5 = inlined_call_operand.vmem [shape: f32[1,128], index: 5, kind: input, shape index: {}]   ;;  %s3492_s6 = inlined_call_operand.vmem [shape: f32[128,128], index: 6, kind: input, shape index: {}]   ;;  %s3493_s7 = inlined_call_operand.vmem [shape: f32[1,128], index: 7, kind: input, shape index: {}]   ;;  %s3494_s8 = inlined_call_operand.vmem [shape: f32[128,64], index: 8, kind: input, shape index: {}]   ;;  %s3495_s9 = inlined_call_operand.vmem [shape: f32[16,128], index: 9, kind: input, shape index: {}]   ;;  %s3496_s10 = inlined_call_operand.vmem [shape: f32[1,128], index: 10, kind: input, shape index: {}]   ;;  %s3497_s11 = inlined_call_operand.vmem [shape: f32[128,32], index: 11, kind: input, shape index: {}]   ;;  %s3498_s12 = inlined_call_operand.vmem [shape: f32[1,32], index: 12, kind: input, shape index: {}]   ;;  %s3499_s13 = inlined_call_operand.vmem [shape: f32[1,32], index: 13, kind: input, shape index: {}]   ;;  %s3500_s14 = inlined_call_operand.vmem [shape: f32[32,128], index: 14, kind: input, shape index: {}]   ;;  %s3501_s15 = inlined_call_operand.vmem [shape: f32[1,128], index: 15, kind: input, shape index: {}]   ;;  %s3502_s16 = inlined_call_operand.vmem [shape: f32[128,32], index: 16, kind: input, shape index: {}]   ;;  %s3503_s17 = inlined_call_operand.vmem [shape: f32[1,32], index: 17, kind: input, shape index: {}]   ;;  %s3504_s18 = inlined_call_operand.hbm [shape: f32[2,8,32], index: 18, kind: output, shape index: {}]  }
   0x1   :  { %3510 = sst [smem:[#allocation13_spill]] %s3486_s0 }
   0x2   :  { %3511 = sst [smem:[#allocation14_spill]] %s3487_s1 }
   0x3   :  { %3512 = sst [smem:[#allocation15_spill]] %s3488_s2 }
   0x4   :  { %3513 = sst [smem:[#allocation16_spill]] %s3489_s3 }
   0x5   :  { %23 = vsyncpa [#allocation6], 0 }
   0x6   :  { %25 = vsyncpa [#allocation6 + $0x1], 0  ;;  %s2637_s27 = smov 0   ;;  %s2639_s28 = smov 0  }
   0x7   :  { %s2641_s29 = smov 0   ;;  %s2643_s30 = smov 0  }
   0x8 LB: > { %3514 = sst [smem:[#allocation8_spill]] %s2524_s27  ;;  %s2658_s0 = sadd.s32 4294967295, %s2536_s30   ;;  %s2536_s30 = sphi %s2643_s30, %s3527_s30   ;;  %s2532_s29 = sphi %s2641_s29, %s3529_s29   ;;  %s2528_s28 = sphi %s2639_s28, %s3531_s28   ;;  %s2524_s27 = sphi %s2637_s27, %s3530_s27  }
   0x9   : > { %3515 = sst [smem:[#allocation9_spill]] %s2532_s29  ;;  %s2126_s19 = sadd.s32 4294967294, %s2536_s30  }
   0xa   : > { %s2662_s1 = sadd.s32 1, %s2536_s30   ;;  %s421_s20 = sadd.s32 1, %s2532_s29 }
   0xb   : > { %3516 = sst [smem:[#allocation10_spill]] %s2662_s1  ;;  %s418_s21 = ssub.s32 %s2536_s30, %s2662_s1 }
   0xc   : > { %p431_p0 = scmp.ne.s32.totalorder %s2532_s29, %s2528_s28  ;;  %p419_p1 = scmp.eq.s32.totalorder %s418_s21, 0 }
   0xd   : > { %p432_p2 = scmp.eq.s32.totalorder %s2658_s0, 1  ;;  %p437_p3 = scmp.ne.s32.totalorder %s2528_s28, %s2524_s27 }
   0xe   : > { %p438_p4 = scmp.eq.s32.totalorder %s2126_s19, 1  ;;  %p2129_p7 = scmp.ge.s32.totalorder %s2536_s30, 1 }
   0xf   : > { %s2673_s22 = scalar_select %p419_p1, %s2532_s29, %s421_s20  }
  0x10   : > { %p2675_p5 = por %p432_p2, %p431_p0  ;;  %p2679_p6 = por %p438_p4, %p437_p3 }
  0x11   : > { %3517 = sst [smem:[#allocation11_spill]] %s2673_s22  ;;  %p514_p8 = scmp.lt.s32.totalorder %s2536_s30, 3 }
  0x12   : > { %s3519_s23 = scalar_select %p2679_p6, 1, 0 }
  0x13   : > { %p515_p9 = pnand %p2129_p7, %p514_p8 }
  0x14   : > { %3520 = sst [smem:[#allocation12_spill]] %s3519_s23  ;;  %p567_p10 = scmp.lt.s32.totalorder (!%p515_p9), %s2658_s0, 1 }
  0x15   : > { %518 = sbr.rel (%p515_p9) target bundleno = 2317 (0x90d), region = 92  ;;  %s3521_s20 = sld [smem:[#allocation13_spill]] (!%p515_p9) }
  0x16   : > { %s3522_s26 = sld [smem:[#allocation14_spill]] (!%p515_p9)  ;;  %s2147_s29 = sshll.u32 (!%p515_p9), %s2658_s0, 7 }
  0x17   : > { %s3523_s22 = sld [smem:[#allocation15_spill]] (!%p515_p9) }
  0x18   : > { %s3524_s3 = sld [smem:[#allocation16_spill]] (!%p515_p9) }
  0x1a   : > { %s568_s24 = scalar_select %p567_p10, %s2658_s0, 1  ;;  %vm574_vm0 = vcmask 261120   ;;  %v2538_v7 = vmov 0.0   ;;  %vm2539_vm1 = vmmov 0   ;;  %v603_v11 = vlaneseq  ;;  %v850_v42 = vld [vmem:[%s3492_s6 + $0x78] sm:$0xff]  ;;  %v849_v44 = vld [vmem:[%s3492_s6 + $0x70] sm:$0xff] }
  0x1b   : > { %2225 = vmatprep.subr.mxu0 %v2538_v7  ;;  %774 = vmatprep.mubr.f32.mxu1 %v2538_v7  ;;  %vm611_vm3 = vcmask 64512   ;;  %vm706_vm4 = vcmask 523264   ;;  %v958_v43 = vld [vmem:[%s3494_s8 + $0x78] sm:$0xff]  ;;  %v957_v45 = vld [vmem:[%s3494_s8 + $0x70] sm:$0xff]  ;;  %v848_v46 = vld [vmem:[%s3492_s6 + $0x68] sm:$0xff]  ;;  %s2541_s0 = smov [#allocation5]  }
  0x1c   : > { %s2131_s25 = sshll.u32 %s568_s24, 3  ;;  %2227 = vmatprep.mubr.msk.f32.mxu0 %vm2539_vm1, %v2538_v7  ;;  %v2699_v12 = vshrl.u32 %v603_v11, 7  ;;  %v2701_v13 = vand.u32 127, %v603_v11  ;;  %v2132_v16 = vld [vmem:[%s3522_s26] ss:$0 sm:$0xff]  ;;  %s2540_s26 = smov 32  }
  0x1d   : > { %s2690_s21 = scalar_lea.vmem %s3521_s20, %s2131_s25  ;;  %v2133_v18 = vld [vmem:[%s3523_s22] ss:$0 sm:$0xff]  ;;  %v956_v47 = vld [vmem:[%s3494_s8 + $0x68] sm:$0xff]  ;;  %v846_v50 = vld [vmem:[%s3492_s6 + $0x58] sm:$0xff] }
  0x1e   : > { %v571_v0 = vld [vmem:[%s2690_s21] sm:$0xff]  ;;  %v607_v14 = vadd.s32 %v2701_v13, %v2699_v12  ;;  %v705_v22 = vld [vmem:[%s3524_s3 + $0x78] sm:$0xff]  ;;  %v704_v23 = vld [vmem:[%s3524_s3 + $0x70] sm:$0xff]  ;;  %v2896_v11 = vsub.s32 3, %v2699_v12  ;;  %vm795_vm5 = vcmp.ge.s32.totalorder %v2699_v12, 1  ;;  %vm806_vm6 = vcmp.ge.s32.totalorder %v2699_v12, 2 }
  0x1f   : > { %v575_v1 = vsel %vm574_vm0, %v571_v0, 0.0  ;;  %v703_v24 = vld [vmem:[%s3524_s3 + $0x68] sm:$0xff]  ;;  %726 = vmatprep.subr.mxu1 %v705_v22  ;;  %v702_v25 = vld [vmem:[%s3524_s3 + $0x60] sm:$0xff]  ;;  %v701_v26 = vld [vmem:[%s3524_s3 + $0x58] sm:$0xff]  ;;  %vm817_vm7 = vcmp.ge.s32.totalorder %v2699_v12, 3  ;;  %vm1029_vm9 = vcmp.lt.s32.totalorder %v2701_v13, 64 }
  0x20   : > { %576 = vadd.xlane.f32.xlu0 %v575_v1  ;;  %vm608_vm2 = vcmp.eq.s32.totalorder %v607_v14, 7  ;;  %727 = vmatpush1.msra.mxu1 %v704_v23  ;;  %v700_v27 = vld [vmem:[%s3524_s3 + $0x50] sm:$0xff]  ;;  %v699_v28 = vld [vmem:[%s3524_s3 + $0x48] sm:$0xff]  ;;  %v698_v29 = vld [vmem:[%s3524_s3 + $0x40] sm:$0xff] }
  0x21   : > { %v2134_v21 = vsel %vm608_vm2, 1.0, %v2538_v7  ;;  %728 = vmatprep.subr.mxu1 %v703_v24  ;;  %v697_v30 = vld [vmem:[%s3524_s3 + $0x38] sm:$0xff]  ;;  %v696_v31 = vld [vmem:[%s3524_s3 + $0x30] sm:$0xff]  ;;  %v695_v32 = vld [vmem:[%s3524_s3 + $0x28] sm:$0xff] }
  0x22   : > { %729 = vmatpush1.msra.mxu1 %v702_v25  ;;  %v694_v33 = vld [vmem:[%s3524_s3 + $0x20] sm:$0xff]  ;;  %v693_v34 = vld [vmem:[%s3524_s3 + $0x18] sm:$0xff]  ;;  %v692_v35 = vld [vmem:[%s3524_s3 + $0x10] sm:$0xff] }
  0x23   : > { %730 = vmatprep.subr.mxu1 %v701_v26  ;;  %v691_v36 = vld [vmem:[%s3524_s3 + $0x8] sm:$0xff]  ;;  %v690_v37 = vld [vmem:[%s3524_s3] sm:$0xff]  ;;  %v954_v51 = vld [vmem:[%s3494_s8 + $0x58] sm:$0xff] }
  0x24   : > { %731 = vmatpush1.msra.mxu1 %v700_v27  ;;  %v847_v48 = vld [vmem:[%s3492_s6 + $0x60] sm:$0xff]  ;;  %v845_v52 = vld [vmem:[%s3492_s6 + $0x50] sm:$0xff]  ;;  %v844_v54 = vld [vmem:[%s3492_s6 + $0x48] sm:$0xff] }
  0x25   : > { %732 = vmatprep.subr.mxu1 %v699_v28  ;;  %v955_v49 = vld [vmem:[%s3494_s8 + $0x60] sm:$0xff]  ;;  %v953_v53 = vld [vmem:[%s3494_s8 + $0x50] sm:$0xff]  ;;  %v952_v55 = vld [vmem:[%s3494_s8 + $0x48] sm:$0xff] }
  0x26   : > { %733 = vmatpush1.msra.mxu1 %v698_v29  ;;  %v843_v56 = vld [vmem:[%s3492_s6 + $0x40] sm:$0xff]  ;;  %v842_v58 = vld [vmem:[%s3492_s6 + $0x38] sm:$0xff]  ;;  %v841_v60 = vld [vmem:[%s3492_s6 + $0x30] sm:$0xff] }
  0x27   : > { %734 = vmatprep.subr.mxu1 %v697_v30  ;;  %v951_v57 = vld [vmem:[%s3494_s8 + $0x40] sm:$0xff]  ;;  %v950_v59 = vld [vmem:[%s3494_s8 + $0x38] sm:$0xff]  ;;  %v949_v61 = vld [vmem:[%s3494_s8 + $0x30] sm:$0xff] }
  0x28   : > { %735 = vmatpush1.msra.mxu1 %v696_v31  ;;  %v840_v62 = vld [vmem:[%s3492_s6 + $0x28] sm:$0xff]  ;;  %v947_v1 = vld [vmem:[%s3494_s8 + $0x20] sm:$0xff] }
  0x29   : > { %736 = vmatprep.subr.mxu1 %v695_v32  ;;  %v948_v63 = vld [vmem:[%s3494_s8 + $0x28] sm:$0xff]  ;;  %v781_v14 = vld [vmem:[%s3490_s4] sm:$0xf] }
  0x2a   : > { %737 = vmatpush1.msra.mxu1 %v694_v33 }
  0x2b   : > { %738 = vmatprep.subr.mxu1 %v693_v34 }
  0x2c   : > { %739 = vmatpush1.msra.mxu1 %v692_v35 }
  0x2d   : > { %740 = vmatprep.subr.mxu1 %v691_v36 }
  0x2e   : > { %741 = vmatpush1.msra.mxu1 %v690_v37 }
  0x2f   : > { %2265 = vmatprep.subr.mxu1 %v2538_v7 }
  0xa9   : > { %v577_v2 = vpop.xlane.xlu0 %576 }
  0xaa   : > { %v579_v3 = vmul.f32 0.03125, %v577_v2  ;;  %v838_v2 = vld [vmem:[%s3492_s6 + $0x18] sm:$0xff] }
  0xac   : > { %v580_v4 = vsub.f32 %v571_v0, %v579_v3  ;;  %v839_v0 = vld [vmem:[%s3492_s6 + $0x20] sm:$0xff]  ;;  %v946_v3 = vld [vmem:[%s3494_s8 + $0x18] sm:$0xff] }
  0xae   : > { %v581_v5 = vmul.f32 %v580_v4, %v580_v4 }
  0xb0   : > { %v582_v6 = vsel %vm574_vm0, %v581_v5, 0.0  ;;  %v945_v5 = vld [vmem:[%s3494_s8 + $0x10] sm:$0xff] }
  0xb1   : > { %583 = vadd.xlane.f32.xlu0 %v582_v6  ;;  %v836_v6 = vld [vmem:[%s3492_s6 + $0x8] sm:$0xff] }
 0x13a   : > { %v584_v8 = vpop.xlane.xlu0 %583 }
 0x13b   : > { %v585_v9 = vmul.f32 0.03125, %v584_v8  ;;  %v944_v8 = vld [vmem:[%s3494_s8 + $0x8] sm:$0xff] }
 0x13d   : > { %v586_v10 = vadd.f32 1e-05, %v585_v9  ;;  %v835_v9 = vld [vmem:[%s3492_s6] sm:$0xff] }
 0x13f   : > { %2423 = vrsqrt.f32 %v586_v10  ;;  %v943_v10 = vld [vmem:[%s3494_s8] sm:$0xff] }
 0x14c   : > { %v2424_v15 = vpop.eup %2423 }
 0x14d   : > { %v588_v17 = vmul.f32 %v2424_v15, %v580_v4  ;;  %v837_v4 = vld [vmem:[%s3492_s6 + $0x10] sm:$0xff]  ;;  %v2902_v15 = vsub.s32 2, %v2699_v12 }
 0x14f   : > { %v595_v19 = vmul.f32 %v2132_v16, %v588_v17  ;;  %v786_v16 = vrot.slane %v781_v14, %v2896_v11  ;;  %v2906_v17 = vsub.s32 1, %v2699_v12 }
 0x151   : > { %v602_v20 = vadd.f32 %v2133_v18, %v595_v19  ;;  %v2137_v19 = vld [vmem:[%s3491_s5] ss:$0 sm:$0xff]  ;;  %v814_v26 = vrot.slane %v781_v14, %v2906_v17 }
 0x153   : > { %2226 = vmatpush3.msra.mxu0 %v602_v20 }
 0x154   : > { %2228 = vmatmul.mubr.msk.f32.vlgmr.msra.gmra.mxu0 %vm611_vm3, %v2134_v21  ;;  %2230 = vmatprep.subr.mxu0 %v2538_v7  ;;  %v2915_v21 = vsub.s32 0, %v2699_v12 }
 0x155   : > { %2262 = vmatprep.mubr.msk.f32.mxu0 %vm2539_vm1, %v2538_v7  ;;  %2231 = vmatpush3.msra.mxu0 %v850_v42 }
 0x156   : > { %2232 = vmatprep.subr.mxu0 %v2538_v7  ;;  %v825_v31 = vrot.slane %v781_v14, %v2915_v21 }
 0x157   : > { %2233 = vmatpush3.msra.mxu0 %v849_v44 }
 0x158   : > { %2234 = vmatprep.subr.mxu0 %v2538_v7 }
 0x159   : > { %2235 = vmatpush3.msra.mxu0 %v848_v46 }
 0x15a   : > { %2236 = vmatprep.subr.mxu0 %v2538_v7 }
 0x15b   : > { %2237 = vmatpush3.msra.mxu0 %v847_v48 }
 0x15c   : > { %2238 = vmatprep.subr.mxu0 %v2538_v7 }
 0x15d   : > { %2239 = vmatpush3.msra.mxu0 %v846_v50 }
 0x15e   : > { %2240 = vmatprep.subr.mxu0 %v2538_v7 }
 0x15f   : > { %2241 = vmatpush3.msra.mxu0 %v845_v52 }
 0x160   : > { %2242 = vmatprep.subr.mxu0 %v2538_v7 }
 0x161   : > { %2243 = vmatpush3.msra.mxu0 %v844_v54 }
 0x162   : > { %2244 = vmatprep.subr.mxu0 %v2538_v7 }
 0x163   : > { %2245 = vmatpush3.msra.mxu0 %v843_v56 }
 0x164   : > { %2246 = vmatprep.subr.mxu0 %v2538_v7 }
 0x165   : > { %2247 = vmatpush3.msra.mxu0 %v842_v58  ;;  %v1079_v58 = vsub.s32 4, %v2699_v12 }
 0x166   : > { %2248 = vmatprep.subr.mxu0 %v2538_v7 }
 0x167   : > { %2249 = vmatpush3.msra.mxu0 %v841_v60 }
 0x168   : > { %2250 = vmatprep.subr.mxu0 %v2538_v7 }
 0x169   : > { %2251 = vmatpush3.msra.mxu0 %v840_v62  ;;  %v1090_v62 = vsub.s32 5, %v2699_v12 }
 0x16a   : > { %2252 = vmatprep.subr.mxu0 %v2538_v7 }
 0x16b   : > { %2253 = vmatpush3.msra.mxu0 %v839_v0 }
 0x16c   : > { %2254 = vmatprep.subr.mxu0 %v2538_v7 }
 0x16d   : > { %2255 = vmatpush3.msra.mxu0 %v838_v2 }
 0x16e   : > { %2256 = vmatprep.subr.mxu0 %v2538_v7 }
 0x16f   : > { %2257 = vmatpush3.msra.mxu0 %v837_v4 }
 0x170   : > { %2258 = vmatprep.subr.mxu0 %v2538_v7 }
 0x171   : > { %2259 = vmatpush3.msra.mxu0 %v836_v6 }
 0x172   : > { %2260 = vmatprep.subr.mxu0 %v2538_v7 }
 0x173   : > { %2261 = vmatpush3.msra.mxu0 %v835_v9 }
 0x174   : > { %2300 = vmatprep.subr.mxu0 %v2538_v7 }
 0x214   : > { %v681_v38 = vpop.f32.mrf.mxu0 }
 0x215   : > { %686 = vrot.lane.b32.xlu1 %v681_v38, %s2540_s26  ;;  %s564_s26 = sand.u32 1, %s2528_s28  }
 0x216   : > { %v2229_v39 = vpop.f32.mrf.mxu0  ;;  %s2130_s19 = sshll.u32 %s564_s26, 3  ;;  %s2054_s25 = scalar_lea.sflag [#allocation6], %s564_s26 }
 0x217   : > { %s566_s1 = scalar_lea.vmem [#allocation5], %s2130_s19  ;;  %s2480_s19 = sshll.u32 %s2541_s0, 4  ;;  %s2481_s19 = int_to_ptr.vmem [resolvable:$false] %s2480_s19 }
 0x218   : > { %s2067_s27 = sshll.u32 %s566_s1, 4  ;;  %s2482_s22 = scalar_lea.vmem %s2481_s19, 256  ;;  %s2068_s27 = int_to_ptr.vmem [resolvable:$true] %s2067_s27 }
 0x219   : > { %s2476_s3 = scalar_lea.vmem %s2068_s27, 128  ;;  %p2483_p0 = scmp.lt.s32.totalorder %s2068_s27, %s2481_s19 }
 0x21a   : > { %p2477_p11 = scmp.ne.s32.totalorder %s2068_s27, %s2476_s3  ;;  %p2484_p1 = scmp.lt.s32.totalorder %s2482_s22, %s2476_s3 }
 0x21c   : > { %p2478_p12 = pnand %p2477_p11, %p2675_p5  ;;  %p2485_p2 = por %p2484_p1, %p2483_p0 }
 0x21e   : > { %p2479_p13 = pneg %p2478_p12 }
 0x220   : > { %p2486_p3 = pnand %p2485_p2, %p2479_p13 }
 0x287   : > { %v687_v40 = vpop.permute.xlu1 %686 }
 0x288   : > { %v689_v41 = vsel %vm574_vm0, %v602_v20, %v687_v40  ;;  %v803_v20 = vrot.slane %v781_v14, %v2902_v15  ;;  %v1112_v14 = vsub.s32 7, %v2699_v12 }
 0x289   : > { %2136 = vmatmul.mubr.msk.f32.vlgmr.msra.gmra.mxu1 %vm706_vm4, %v689_v41 }
 0x28a   : > { %2297 = vmatprep.mubr.msk.f32.mxu1 %vm2539_vm1, %v2538_v7  ;;  %2266 = vmatpush3.msra.mxu1 %v958_v43 }
 0x28b   : > { %2267 = vmatprep.subr.mxu1 %v2538_v7 }
 0x28c   : > { %2268 = vmatpush3.msra.mxu1 %v957_v45  ;;  %v2138_v45 = vld [vmem:[%s3493_s7] ss:$0 sm:$0xff] }
 0x28d   : > { %2269 = vmatprep.subr.mxu1 %v2538_v7 }
 0x28e   : > { %2270 = vmatpush3.msra.mxu1 %v956_v47 }
 0x28f   : > { %2271 = vmatprep.subr.mxu1 %v2538_v7 }
 0x290   : > { %2272 = vmatpush3.msra.mxu1 %v955_v49 }
 0x291   : > { %2273 = vmatprep.subr.mxu1 %v2538_v7 }
 0x292   : > { %2274 = vmatpush3.msra.mxu1 %v954_v51 }
 0x293   : > { %2275 = vmatprep.subr.mxu1 %v2538_v7 }
 0x294   : > { %2276 = vmatpush3.msra.mxu1 %v953_v53 }
 0x295   : > { %2277 = vmatprep.subr.mxu1 %v2538_v7 }
 0x296   : > { %2278 = vmatpush3.msra.mxu1 %v952_v55 }
 0x297   : > { %2279 = vmatprep.subr.mxu1 %v2538_v7 }
 0x298   : > { %2280 = vmatpush3.msra.mxu1 %v951_v57 }
 0x299   : > { %2281 = vmatprep.subr.mxu1 %v2538_v7 }
 0x29a   : > { %2282 = vmatpush3.msra.mxu1 %v950_v59 }
 0x29b   : > { %2283 = vmatprep.subr.mxu1 %v2538_v7 }
 0x29c   : > { %2284 = vmatpush3.msra.mxu1 %v949_v61 }
 0x29d   : > { %2285 = vmatprep.subr.mxu1 %v2538_v7 }
 0x29e   : > { %2286 = vmatpush3.msra.mxu1 %v948_v63 }
 0x29f   : > { %2287 = vmatprep.subr.mxu1 %v2538_v7 }
 0x2a0   : > { %2288 = vmatpush3.msra.mxu1 %v947_v1  ;;  %v1101_v1 = vsub.s32 6, %v2699_v12 }
 0x2a1   : > { %2289 = vmatprep.subr.mxu1 %v2538_v7 }
 0x2a2   : > { %2290 = vmatpush3.msra.mxu1 %v946_v3 }
 0x2a3   : > { %2291 = vmatprep.subr.mxu1 %v2538_v7 }
 0x2a4   : > { %2292 = vmatpush3.msra.mxu1 %v945_v5 }
 0x2a5   : > { %2293 = vmatprep.subr.mxu1 %v2538_v7 }
 0x2a6   : > { %2294 = vmatpush3.msra.mxu1 %v944_v8 }
 0x2a7   : > { %2295 = vmatprep.subr.mxu1 %v2538_v7 }
 0x2a8   : > { %2296 = vmatpush3.msra.mxu1 %v943_v10 }
 0x2a9   : > { %2346 = vmatprep.subr.mxu1 %v2538_v7 }
 0x349   : > { %v776_v18 = vpop.f32.mrf.mxu1 }
 0x34a   : > { %v787_v22 = vmul.f32 %v786_v16, %v776_v18  ;;  %v796_v23 = vrot.slane %v776_v18, 7  ;;  %v807_v24 = vrot.slane %v776_v18, 6  ;;  %v818_v25 = vrot.slane %v776_v18, 5 }
 0x34b   : > { %v2928_v44 = vpop.f32.mrf.mxu1 }
 0x34c   : > { %v794_v27 = vadd.f32 %v2137_v19, %v787_v22  ;;  %v799_v28 = vsel %vm795_vm5, %v796_v23, 0.0  ;;  %v810_v29 = vsel %vm806_vm6, %v807_v24, 0.0  ;;  %v821_v32 = vsel %vm817_vm7, %v818_v25, 0.0 }
 0x34d   : > { %v804_v30 = vmul.f32 %v803_v20, %v799_v28  ;;  %v815_v34 = vmul.f32 %v814_v26, %v810_v29  ;;  %v826_v36 = vmul.f32 %v825_v31, %v821_v32  ;;  %v3042_v29 = vld [vmem:[%s3495_s9] sm:$0xff]  ;;  %v3048_v31 = vld [vmem:[%s3495_s9 + $0x8] sm:$0xff] }
 0x34f   : > { %v805_v33 = vadd.f32 %v804_v30, %v794_v27 }
 0x351   : > { %v816_v35 = vadd.f32 %v815_v34, %v805_v33 }
 0x353   : > { %v827_v37 = vadd.f32 %v826_v36, %v816_v35 }
 0x355   : > { %v828_v38 = vsub.f32 0.0, %v827_v37 }
 0x357   : > { %v829_v39 = vmul.f32 1.442695, %v828_v38 }
 0x359   : > { %2425 = vpow2.f32 %v829_v39  ;;  %v3063_v39 = vsel %vm1029_vm9, 1.0, %v2538_v7 }
 0x35a   : > { %v3070_v13 = vsub.f32 1.0, %v3063_v39 }
 0x366   : > { %v2426_v40 = vpop.eup %2425 }
 0x367   : > { %v831_v41 = vadd.f32 1.0, %v2426_v40 }
 0x369   : > { %2427 = vrcp.f32 %v831_v41 }
 0x376   : > { %v2428_v42 = vpop.eup %2427 }
 0x377   : > { %v2920_v43 = vmul.f32 %v2428_v42, %v827_v37 }
 0x379   : > { %2263 = vmatmul.mubr.f32.vlgmr.msra.gmra.mxu0 %v2920_v43  ;;  %2298 = vmatmul.mubr.f32.vlgmr.msra.gmra.mxu1 %v2920_v43 }
 0x37a   : > { %2332 = vmatprep.mubr.msk.f32.mxu0 %vm2539_vm1, %v2538_v7  ;;  %2378 = vmatprep.mubr.msk.f32.mxu1 %vm2539_vm1, %v2538_v7 }
 0x439   : > { %v924_v46 = vpop.f32.mrf.mxu0  ;;  %v1025_v47 = vpop.f32.mrf.mxu1 }
 0x43a   : > { %v925_v48 = vadd.f32 %v2138_v45, %v924_v46  ;;  %v2934_v49 = vrot.slane %v1025_v47, %v2915_v21  ;;  %v2939_v54 = vrot.slane %v1025_v47, %v2902_v15  ;;  %v2946_v56 = vrot.slane %v1025_v47, %v2906_v17 }
 0x43b   : > { %v2264_v50 = vpop.f32.mrf.mxu0  ;;  %v2299_v51 = vpop.f32.mrf.mxu1  ;;  %v2949_v57 = vrot.slane %v1025_v47, %v2896_v11  ;;  %v2956_v59 = vrot.slane %v1025_v47, %v1079_v58  ;;  %v2963_v63 = vrot.slane %v1025_v47, %v1090_v62  ;;  %v2970_v4 = vrot.slane %v1025_v47, %v1101_v1 }
 0x43c   : > { %v929_v52 = vand.u32 2147483647, %v925_v48  ;;  %1042 = vbcast.lane.b32.xlu0 %v2934_v49, 264  ;;  %1038 = vbcast.lane.b32.xlu1 %v2934_v49, 256  ;;  %v928_v9 = vmax.f32 %v925_v48, 0.0  ;;  %v2983_v19 = vrot.slane %v1025_v47, %v1112_v14 }
 0x43e   : > { %v930_v53 = vsub.f32 0.0, %v929_v52 }
 0x440   : > { %v931_v55 = vmul.f32 1.442695, %v930_v53  ;;  %1060 = vbcast.lane.b32.xlu0 %v2939_v54, 256  ;;  %1139 = vbcast.lane.b32.xlu1 %v2934_v49, 272 }
 0x442   : > { %2429 = vpow2.f32 %v931_v55 }
 0x444   : > { %1155 = vbcast.lane.b32.xlu0 %v2939_v54, 272  ;;  %1143 = vbcast.lane.b32.xlu1 %v2934_v49, 280 }
 0x448   : > { %1071 = vbcast.lane.b32.xlu0 %v2949_v57, 256  ;;  %1049 = vbcast.lane.b32.xlu1 %v2946_v56, 256 }
 0x44c   : > { %1163 = vbcast.lane.b32.xlu0 %v2949_v57, 272  ;;  %1053 = vbcast.lane.b32.xlu1 %v2946_v56, 264 }
 0x44f   : > { %v2430_v60 = vpop.eup %2429 }
 0x450   : > { %v933_v61 = vadd.f32 1.0, %v2430_v60  ;;  %1082 = vbcast.lane.b32.xlu0 %v2956_v59, 256  ;;  %1147 = vbcast.lane.b32.xlu1 %v2946_v56, 272  ;;  %v936_v0 = vmul.f32 -0.5, %v2430_v60  ;;  %v939_v3 = vand.u32 2147483647, %v2430_v60 }
 0x452   : > { %2431 = vlog2.f32 %v933_v61  ;;  %v937_v2 = vadd.f32 1.0, %v936_v0  ;;  %vm940_vm8 = vcmp.lt.f32.partialorder %v939_v3, 0.0004427343 }
 0x454   : > { %1171 = vbcast.lane.b32.xlu0 %v2956_v59, 272  ;;  %1151 = vbcast.lane.b32.xlu1 %v2946_v56, 280  ;;  %v938_v8 = vmul.f32 %v2430_v60, %v937_v2 }
 0x458   : > { %1093 = vbcast.lane.b32.xlu0 %v2963_v63, 256  ;;  %1064 = vbcast.lane.b32.xlu1 %v2939_v54, 264 }
 0x45c   : > { %1179 = vbcast.lane.b32.xlu0 %v2963_v63, 272  ;;  %1159 = vbcast.lane.b32.xlu1 %v2939_v54, 280 }
 0x45f   : > { %v2432_v5 = vpop.eup %2431 }
 0x460   : > { %v935_v6 = vmul.f32 0.6931472, %v2432_v5  ;;  %1104 = vbcast.lane.b32.xlu0 %v2970_v4, 256  ;;  %1075 = vbcast.lane.b32.xlu1 %v2949_v57, 264 }
 0x462   : > { %v941_v10 = vsel %vm940_vm8, %v938_v8, %v935_v6 }
 0x463   : > { %v2975_v16 = vadd.f32 %v941_v10, %v928_v9 }
 0x464   : > { %1187 = vbcast.lane.b32.xlu0 %v2970_v4, 272  ;;  %1167 = vbcast.lane.b32.xlu1 %v2949_v57, 280 }
 0x465   : > { %v2981_v18 = vmul.f32 %v2975_v16, %v2920_v43  ;;  %v2986_v20 = vrot.slane %v2975_v16, %v1079_v58  ;;  %v2989_v22 = vrot.slane %v2975_v16, %v1090_v62  ;;  %v2992_v12 = vrot.slane %v2975_v16, %v1101_v1 }
 0x466   : > { %v3011_v27 = vrot.slane %v2975_v16, %v1112_v14  ;;  %v1447_v28 = vrot.slane %v2975_v16, %v2915_v21  ;;  %v1481_v32 = vrot.slane %v2975_v16, %v2906_v17  ;;  %v1553_v60 = vrot.slane %v2975_v16, %v2896_v11 }
 0x467   : > { %v2997_v23 = vrot.slane %v2981_v18, %v1079_v58  ;;  %v3000_v24 = vrot.slane %v2981_v18, %v1090_v62  ;;  %v3003_v25 = vrot.slane %v2981_v18, %v1101_v1  ;;  %v3006_v26 = vrot.slane %v2981_v18, %v1112_v14 }
 0x468   : > { %1115 = vbcast.lane.b32.xlu0 %v2983_v19, 256  ;;  %1086 = vbcast.lane.b32.xlu1 %v2956_v59, 264  ;;  %v1448_v30 = vmul.f32 %v1447_v28, %v3042_v29  ;;  %v1449_v33 = vmul.f32 %v1447_v28, %v3048_v31  ;;  %v1482_v35 = vmul.f32 %v1481_v32, %v3042_v29 }
 0x469   : > { %v1483_v37 = vmul.f32 %v1481_v32, %v3048_v31  ;;  %v1461_v55 = vrot.slane %v2981_v18, %v2915_v21  ;;  %v1554_v14 = vmul.f32 %v1553_v60, %v3042_v29 }
 0x46a   : > { %v1450_v34 = vmul.f32 1.442695, %v1448_v30  ;;  %v1452_v36 = vmul.f32 1.442695, %v1449_v33  ;;  %v1484_v38 = vmul.f32 1.442695, %v1482_v35 }
 0x46b   : > { %v1486_v40 = vmul.f32 1.442695, %v1483_v37 }
 0x46c   : > { %1195 = vbcast.lane.b32.xlu0 %v2983_v19, 272  ;;  %1175 = vbcast.lane.b32.xlu1 %v2956_v59, 280  ;;  %2433 = vpow2.f32 %v1450_v34 }
 0x46d   : > { %2435 = vpow2.f32 %v1452_v36 }
 0x46e   : > { %2437 = vpow2.f32 %v1484_v38 }
 0x46f   : > { %2439 = vpow2.f32 %v1486_v40  ;;  %v1556_v40 = vmul.f32 1.442695, %v1554_v14 }
 0x470   : > { %1251 = vbcast.lane.b32.xlu0 %v2934_v49, 288  ;;  %1097 = vbcast.lane.b32.xlu1 %v2963_v63, 264 }
 0x474   : > { %1259 = vbcast.lane.b32.xlu0 %v2946_v56, 288  ;;  %1183 = vbcast.lane.b32.xlu1 %v2963_v63, 280 }
 0x478   : > { %1267 = vbcast.lane.b32.xlu0 %v2939_v54, 288  ;;  %1108 = vbcast.lane.b32.xlu1 %v2970_v4, 264 }
 0x479   : > { %v2434_v52 = vpop.eup %2433 }
 0x47a   : > { %v2436_v61 = vpop.eup %2435  ;;  %v1454_v2 = vmul.f32 0.0, %v2434_v52  ;;  %v1626_v52 = vmul.f32 %v2989_v22, %v3042_v29 }
 0x47b   : > { %v2438_v28 = vpop.eup %2437 }
 0x47c   : > { %1275 = vbcast.lane.b32.xlu0 %v2949_v57, 288  ;;  %1191 = vbcast.lane.b32.xlu1 %v2970_v4, 280  ;;  %v2440_v36 = vpop.eup %2439 }
 0x480   : > { %1283 = vbcast.lane.b32.xlu0 %v2956_v59, 288  ;;  %1119 = vbcast.lane.b32.xlu1 %v2983_v19, 264 }
 0x484   : > { %1291 = vbcast.lane.b32.xlu0 %v2963_v63, 288  ;;  %1199 = vbcast.lane.b32.xlu1 %v2983_v19, 280 }
 0x488   : > { %1299 = vbcast.lane.b32.xlu0 %v2970_v4, 288  ;;  %1255 = vbcast.lane.b32.xlu1 %v2934_v49, 296 }
 0x48c   : > { %1307 = vbcast.lane.b32.xlu0 %v2983_v19, 288  ;;  %1263 = vbcast.lane.b32.xlu1 %v2946_v56, 296 }
 0x490   : > { %1331 = vbcast.lane.b32.xlu0 %v2934_v49, 304  ;;  %1271 = vbcast.lane.b32.xlu1 %v2939_v54, 296 }
 0x494   : > { %1339 = vbcast.lane.b32.xlu0 %v2946_v56, 304  ;;  %1279 = vbcast.lane.b32.xlu1 %v2949_v57, 296 }
 0x498   : > { %1347 = vbcast.lane.b32.xlu0 %v2939_v54, 304  ;;  %1287 = vbcast.lane.b32.xlu1 %v2956_v59, 296 }
 0x49c   : > { %1355 = vbcast.lane.b32.xlu0 %v2949_v57, 304  ;;  %1295 = vbcast.lane.b32.xlu1 %v2963_v63, 296 }
 0x4a0   : > { %1363 = vbcast.lane.b32.xlu0 %v2956_v59, 304  ;;  %1303 = vbcast.lane.b32.xlu1 %v2970_v4, 296 }
 0x4a4   : > { %1371 = vbcast.lane.b32.xlu0 %v2963_v63, 304  ;;  %1311 = vbcast.lane.b32.xlu1 %v2983_v19, 296 }
 0x4a8   : > { %1379 = vbcast.lane.b32.xlu0 %v2970_v4, 304  ;;  %1335 = vbcast.lane.b32.xlu1 %v2934_v49, 312  ;;  %v1517_v49 = vrot.slane %v2975_v16, %v2902_v15  ;;  %v1455_v16 = vmul.f32 0.0, %v2436_v61  ;;  %v1628_v61 = vmul.f32 1.442695, %v1626_v52 }
 0x4aa   : > { %v1519_v6 = vmul.f32 %v1517_v49, %v3048_v31 }
 0x4ac   : > { %1387 = vbcast.lane.b32.xlu0 %v2983_v19, 304  ;;  %1343 = vbcast.lane.b32.xlu1 %v2946_v56, 312  ;;  %v1522_v35 = vmul.f32 1.442695, %v1519_v6 }
 0x4ae   : > { %v1043_v41 = vpop.permute.xlu0 %1042  ;;  %v1039_v42 = vpop.permute.xlu1 %1038 }
 0x4af   : > { %v1122_v45 = vmul.f32 %v3063_v39, %v1043_v41  ;;  %v1121_v46 = vmul.f32 %v3063_v39, %v1039_v42  ;;  %v1590_v41 = vmul.f32 %v2986_v20, %v3042_v29 }
 0x4b0   : > { %1351 = vbcast.lane.b32.xlu1 %v2939_v54, 312  ;;  %v1518_v54 = vmul.f32 %v1517_v49, %v3042_v29 }
 0x4b2   : > { %v1061_v47 = vpop.permute.xlu0 %1060  ;;  %v1140_v48 = vpop.permute.xlu1 %1139  ;;  %v1520_v10 = vmul.f32 1.442695, %v1518_v54 }
 0x4b3   : > { %v1125_v50 = vmul.f32 %v3063_v39, %v1061_v47  ;;  %v1201_v51 = vmul.f32 %v1140_v48, %v3070_v13  ;;  %v3111_v47 = vrot.slane %v2981_v18, %v2896_v11  ;;  %v1555_v48 = vmul.f32 %v1553_v60, %v3048_v31 }
 0x4b4   : > { %1359 = vbcast.lane.b32.xlu1 %v2949_v57, 312  ;;  %v3087_v57 = vrot.slane %v2981_v18, %v2902_v15  ;;  %2441 = vpow2.f32 %v1520_v10  ;;  %v1698_v10 = vmul.f32 %v3011_v27, %v3042_v29 }
 0x4b5   : > { %v1217_v53 = vadd.f32 %v1201_v51, %v1121_v46  ;;  %2443 = vpow2.f32 %v1522_v35  ;;  %v1592_v51 = vmul.f32 1.442695, %v1590_v41 }
 0x4b6   : > { %v1156_v56 = vpop.permute.xlu0 %1155  ;;  %v1144_v58 = vpop.permute.xlu1 %1143  ;;  %2445 = vpow2.f32 %v1556_v40 }
 0x4b7   : > { %v1462_v62 = vmul.f32 %v1461_v55, %v1217_v53  ;;  %v1205_v0 = vmul.f32 %v1156_v56, %v3070_v13  ;;  %v1202_v1 = vmul.f32 %v1144_v58, %v3070_v13  ;;  %v1496_v56 = vrot.slane %v2981_v18, %v2906_v17  ;;  %v1763_v17 = vld [vmem:[%s3497_s11 + $0x78] sm:$0xff] }
 0x4b8   : > { %1367 = vbcast.lane.b32.xlu1 %v2956_v59, 312  ;;  %v1558_v58 = vmul.f32 1.442695, %v1555_v48  ;;  %2447 = vpow2.f32 %v1592_v51  ;;  %2301 = vmatpush3.msra.mxu0 %v1763_v17 }
 0x4b9   : > { %v1221_v21 = vadd.f32 %v1205_v0, %v1125_v50  ;;  %v1218_v3 = vadd.f32 %v1202_v1, %v1122_v45  ;;  %v3090_v5 = vadd.f32 %v1462_v62, %v1454_v2  ;;  %v1662_v62 = vmul.f32 %v2992_v12, %v3042_v29  ;;  %2302 = vmatprep.subr.mxu0 %v2538_v7 }
 0x4ba   : > { %v1072_v8 = vpop.permute.xlu0 %1071  ;;  %v1050_v9 = vpop.permute.xlu1 %1049  ;;  %2449 = vpow2.f32 %v1558_v58  ;;  %v1757_v58 = vld [vmem:[%s3497_s11 + $0x48] sm:$0xff] }
 0x4bb   : > { %v3095_v30 = vmul.f32 %v3087_v57, %v1221_v21  ;;  %v1463_v15 = vmul.f32 %v1461_v55, %v1218_v3  ;;  %v1127_v32 = vmul.f32 %v3063_v39, %v1072_v8  ;;  %v1123_v59 = vmul.f32 %v3063_v39, %v1050_v9 }
 0x4bc   : > { %1375 = vbcast.lane.b32.xlu1 %v2963_v63, 312  ;;  %v1488_v33 = vmul.f32 %v2438_v28, %v3090_v5  ;;  %2451 = vpow2.f32 %v1628_v61  ;;  %v1664_v9 = vmul.f32 1.442695, %v1662_v62 }
 0x4bd   : > { %v3101_v34 = vadd.f32 %v1463_v15, %v1455_v16 }
 0x4be   : > { %v1164_v37 = vpop.permute.xlu0 %1163  ;;  %v1054_v38 = vpop.permute.xlu1 %1053  ;;  %2453 = vpow2.f32 %v1664_v9 }
 0x4bf   : > { %v1207_v42 = vmul.f32 %v1164_v37, %v3070_v13  ;;  %v1124_v45 = vmul.f32 %v3063_v39, %v1054_v38  ;;  %v1489_v46 = vmul.f32 %v2440_v36, %v3101_v34 }
 0x4c0   : > { %1383 = vbcast.lane.b32.xlu1 %v2970_v4, 312 }
 0x4c1   : > { %v1223_v63 = vadd.f32 %v1207_v42, %v1127_v32  ;;  %v2442_v14 = vpop.eup %2441  ;;  %v1700_v42 = vmul.f32 1.442695, %v1698_v10 }
 0x4c2   : > { %v1083_v49 = vpop.permute.xlu0 %1082  ;;  %v1148_v50 = vpop.permute.xlu1 %1147 }
 0x4c3   : > { %v3117_v53 = vmul.f32 %v3111_v47, %v1223_v63  ;;  %v1129_v4 = vmul.f32 %v3063_v39, %v1083_v49  ;;  %v1203_v55 = vmul.f32 %v1148_v50, %v3070_v13  ;;  %v2444_v37 = vpop.eup %2443 }
 0x4c4   : > { %1391 = vbcast.lane.b32.xlu1 %v2983_v19, 312  ;;  %v1591_v19 = vmul.f32 %v2986_v20, %v3048_v31  ;;  %v1762_v20 = vld [vmem:[%s3497_s11 + $0x70] sm:$0xff]  ;;  %v2446_v63 = vpop.eup %2445 }
 0x4c5   : > { %v1219_v11 = vadd.f32 %v1203_v55, %v1123_v59  ;;  %2303 = vmatpush3.msra.mxu0 %v1762_v20  ;;  %v1761_v59 = vld [vmem:[%s3497_s11 + $0x68] sm:$0xff] }
 0x4c6   : > { %v1172_v54 = vpop.permute.xlu0 %1171  ;;  %v1152_v60 = vpop.permute.xlu1 %1151  ;;  %2304 = vmatprep.subr.mxu0 %v2538_v7  ;;  %v1594_v36 = vmul.f32 1.442695, %v1591_v19 }
 0x4c7   : > { %v1497_v0 = vmul.f32 %v1496_v56, %v1219_v11  ;;  %v1209_v1 = vmul.f32 %v1172_v54, %v3070_v13  ;;  %v1204_v2 = vmul.f32 %v1152_v60, %v3070_v13  ;;  %2305 = vmatpush3.msra.mxu0 %v1761_v59  ;;  %v2448_v54 = vpop.eup %2447 }
 0x4c8   : > { %2306 = vmatprep.subr.mxu0 %v2538_v7  ;;  %2455 = vpow2.f32 %v1594_v36  ;;  %v2450_v19 = vpop.eup %2449 }
 0x4c9   : > { %v1225_v18 = vadd.f32 %v1209_v1, %v1129_v4  ;;  %v1220_v21 = vadd.f32 %v1204_v2, %v1124_v45  ;;  %v3133_v3 = vadd.f32 %v1497_v0, %v1488_v33  ;;  %v1760_v33 = vld [vmem:[%s3497_s11 + $0x60] sm:$0xff]  ;;  %v1759_v45 = vld [vmem:[%s3497_s11 + $0x58] sm:$0xff]  ;;  %v1627_v4 = vmul.f32 %v2989_v22, %v3048_v31 }
 0x4ca   : > { %v1094_v6 = vpop.permute.xlu0 %1093  ;;  %v1065_v8 = vpop.permute.xlu1 %1064  ;;  %2307 = vmatpush3.msra.mxu0 %v1760_v33  ;;  %2457 = vpow2.f32 %v1700_v42  ;;  %v1756_v0 = vld [vmem:[%s3497_s11 + $0x40] sm:$0xff]  ;;  %v1753_v33 = vld [vmem:[%s3497_s11 + $0x28] sm:$0xff] }
 0x4cb   : > { %v1605_v16 = vmul.f32 %v2997_v23, %v1225_v18  ;;  %v1498_v28 = vmul.f32 %v1496_v56, %v1220_v21  ;;  %v1131_v15 = vmul.f32 %v3063_v39, %v1094_v6  ;;  %v1126_v32 = vmul.f32 %v3063_v39, %v1065_v8  ;;  %2308 = vmatprep.subr.mxu0 %v2538_v7  ;;  %v1755_v21 = vld [vmem:[%s3497_s11 + $0x38] sm:$0xff]  ;;  %v2452_v6 = vpop.eup %2451 }
 0x4cc   : > { %v1524_v29 = vmul.f32 %v2442_v14, %v3133_v3  ;;  %2309 = vmatpush3.msra.mxu0 %v1759_v45  ;;  %v1630_v2 = vmul.f32 1.442695, %v1627_v4  ;;  %v1754_v14 = vld [vmem:[%s3497_s11 + $0x30] sm:$0xff]  ;;  %v2454_v36 = vpop.eup %2453  ;;  %v1752_v45 = vld [vmem:[%s3497_s11 + $0x20] sm:$0xff] }
 0x4cd   : > { %v3152_v35 = vadd.f32 %v1498_v28, %v1489_v46  ;;  %2310 = vmatprep.subr.mxu0 %v2538_v7 }
 0x4ce   : > { %v1180_v38 = vpop.permute.xlu0 %1179  ;;  %v1160_v40 = vpop.permute.xlu1 %1159  ;;  %v3155_v41 = vadd.f32 %v3095_v30, %v1524_v29  ;;  %v1758_v30 = vld [vmem:[%s3497_s11 + $0x50] sm:$0xff]  ;;  %2459 = vpow2.f32 %v1630_v2 }
 0x4cf   : > { %v1211_v46 = vmul.f32 %v1180_v38, %v3070_v13  ;;  %v1206_v48 = vmul.f32 %v1160_v40, %v3070_v13  ;;  %v1525_v49 = vmul.f32 %v2444_v37, %v3152_v35  ;;  %2311 = vmatpush3.msra.mxu0 %v1758_v30  ;;  %v1751_v30 = vld [vmem:[%s3497_s11 + $0x18] sm:$0xff] }
 0x4d0   : > { %v1560_v50 = vmul.f32 %v2446_v63, %v3155_v41  ;;  %2312 = vmatprep.subr.mxu0 %v2538_v7 }
 0x4d1   : > { %v1227_v51 = vadd.f32 %v1211_v46, %v1131_v15  ;;  %v1222_v52 = vadd.f32 %v1206_v48, %v1126_v32  ;;  %2313 = vmatpush3.msra.mxu0 %v1757_v58  ;;  %v1663_v15 = vmul.f32 %v2992_v12, %v3048_v31  ;;  %v1750_v58 = vld [vmem:[%s3497_s11 + $0x10] sm:$0xff] }
 0x4d2   : > { %v1105_v55 = vpop.permute.xlu0 %1104  ;;  %v1076_v11 = vpop.permute.xlu1 %1075  ;;  %v3172_v56 = vadd.f32 %v3117_v53, %v1560_v50  ;;  %2314 = vmatprep.subr.mxu0 %v2538_v7 }
 0x4d3   : > { %v1641_v60 = vmul.f32 %v3000_v24, %v1227_v51  ;;  %v1534_v61 = vmul.f32 %v3087_v57, %v1222_v52  ;;  %v1133_v22 = vmul.f32 %v3063_v39, %v1105_v55  ;;  %v1128_v62 = vmul.f32 %v3063_v39, %v1076_v11  ;;  %2315 = vmatpush3.msra.mxu0 %v1756_v0 }
 0x4d4   : > { %v1596_v53 = vmul.f32 %v2448_v54, %v3172_v56  ;;  %2316 = vmatprep.subr.mxu0 %v2538_v7  ;;  %v1666_v46 = vmul.f32 1.442695, %v1663_v15 }
 0x4d5   : > { %v3187_v1 = vadd.f32 %v1534_v61, %v1525_v49  ;;  %2317 = vmatpush3.msra.mxu0 %v1755_v21  ;;  %v2456_v48 = vpop.eup %2455  ;;  %v1699_v61 = vmul.f32 %v3011_v27, %v3048_v31  ;;  %v1748_v27 = vld [vmem:[%s3497_s11] sm:$0xff] }
 0x4d6   : > { %v1188_v17 = vpop.permute.xlu0 %1187  ;;  %v1168_v57 = vpop.permute.xlu1 %1167  ;;  %v3189_v18 = vadd.f32 %v1605_v16, %v1596_v53  ;;  %2318 = vmatprep.subr.mxu0 %v2538_v7  ;;  %2461 = vpow2.f32 %v1666_v46  ;;  %v1749_v53 = vld [vmem:[%s3497_s11 + $0x8] sm:$0xff] }
 0x4d7   : > { %v1213_v8 = vmul.f32 %v1188_v17, %v3070_v13  ;;  %v1208_v9 = vmul.f32 %v1168_v57, %v3070_v13  ;;  %v1561_v10 = vmul.f32 %v2450_v19, %v3187_v1  ;;  %2319 = vmatpush3.msra.mxu0 %v1754_v14  ;;  %v2458_v51 = vpop.eup %2457  ;;  %v1702_v57 = vmul.f32 1.442695, %v1699_v61 }
 0x4d8   : > { %v1632_v20 = vmul.f32 %v2452_v6, %v3189_v18  ;;  %2320 = vmatprep.subr.mxu0 %v2538_v7 }
 0x4d9   : > { %v1229_v16 = vadd.f32 %v1213_v8, %v1133_v22  ;;  %v1224_v28 = vadd.f32 %v1208_v9, %v1128_v62  ;;  %2321 = vmatpush3.msra.mxu0 %v1753_v33  ;;  %2463 = vpow2.f32 %v1702_v57 }
 0x4da   : > { %v1116_v32 = vpop.permute.xlu0 %1115  ;;  %v1087_v59 = vpop.permute.xlu1 %1086  ;;  %v3205_v29 = vadd.f32 %v1641_v60, %v1632_v20  ;;  %2322 = vmatprep.subr.mxu0 %v2538_v7 }
 0x4db   : > { %v1677_v37 = vmul.f32 %v3003_v25, %v1229_v16  ;;  %v1570_v38 = vmul.f32 %v3111_v47, %v1224_v28  ;;  %v1135_v40 = vmul.f32 %v3063_v39, %v1116_v32  ;;  %v1130_v12 = vmul.f32 %v3063_v39, %v1087_v59  ;;  %2323 = vmatpush3.msra.mxu0 %v1752_v45  ;;  %v2460_v21 = vpop.eup %2459 }
 0x4dc   : > { %v1668_v42 = vmul.f32 %v2454_v36, %v3205_v29  ;;  %2324 = vmatprep.subr.mxu0 %v2538_v7 }
 0x4dd   : > { %v3220_v63 = vadd.f32 %v1570_v38, %v1561_v10  ;;  %2325 = vmatpush3.msra.mxu0 %v1751_v30 }
 0x4de   : > { %v1196_v49 = vpop.permute.xlu0 %1195  ;;  %v1176_v47 = vpop.permute.xlu1 %1175  ;;  %v3222_v50 = vadd.f32 %v1677_v37, %v1668_v42  ;;  %2326 = vmatprep.subr.mxu0 %v2538_v7 }
 0x4df   : > { %v1215_v52 = vmul.f32 %v1196_v49, %v3070_v13  ;;  %v1210_v4 = vmul.f32 %v1176_v47, %v3070_v13  ;;  %v1597_v55 = vmul.f32 %v2456_v48, %v3220_v63  ;;  %2327 = vmatpush3.msra.mxu0 %v1750_v58 }
 0x4e0   : > { %v1704_v11 = vmul.f32 %v2458_v51, %v3222_v50  ;;  %2328 = vmatprep.subr.mxu0 %v2538_v7 }
 0x4e1   : > { %v1231_v54 = vadd.f32 %v1215_v52, %v1135_v40  ;;  %v1226_v60 = vadd.f32 %v1210_v4, %v1130_v12  ;;  %2329 = vmatpush3.msra.mxu0 %v1749_v53 }
 0x4e2   : > { %v1252_v22 = vpop.permute.xlu0 %1251  ;;  %v1098_v62 = vpop.permute.xlu1 %1097  ;;  %2330 = vmatprep.subr.mxu0 %v2538_v7 }
 0x4e3   : > { %v1713_v0 = vmul.f32 %v3006_v26, %v1231_v54  ;;  %v1606_v2 = vmul.f32 %v2997_v23, %v1226_v60  ;;  %v1132_v19 = vmul.f32 %v3063_v39, %v1098_v62  ;;  %2331 = vmatpush3.msra.mxu0 %v1748_v27  ;;  %v2462_v32 = vpop.eup %2461  ;;  %v1313_v61 = vmul.f32 %v3063_v39, %v1252_v22 }
 0x4e4   : > { %2335 = vmatprep.subr.mxu0 %v2538_v7 }
 0x4e5   : > { %v3249_v31 = vadd.f32 %v1713_v0, %v1704_v11  ;;  %v3251_v17 = vadd.f32 %v1606_v2, %v1597_v55 }
 0x4e6   : > { %v1260_v6 = vpop.permute.xlu0 %1259  ;;  %v1184_v8 = vpop.permute.xlu1 %1183 }
 0x4e7   : > { %v1212_v23 = vmul.f32 %v1184_v8, %v3070_v13  ;;  %v1633_v9 = vmul.f32 %v2460_v21, %v3251_v17 }
 0x4e9   : > { %v1228_v10 = vadd.f32 %v1212_v23, %v1132_v19  ;;  %v1315_v19 = vmul.f32 %v3063_v39, %v1260_v6 }
 0x4ea   : > { %v1268_v20 = vpop.permute.xlu0 %1267  ;;  %v1109_v14 = vpop.permute.xlu1 %1108 }
 0x4eb   : > { %v1642_v16 = vmul.f32 %v3000_v24, %v1228_v10  ;;  %v1134_v28 = vmul.f32 %v3063_v39, %v1109_v14  ;;  %v2464_v24 = vpop.eup %2463  ;;  %v1317_v23 = vmul.f32 %v3063_v39, %v1268_v20 }
 0x4ed   : > { %v3259_v15 = vadd.f32 %v1642_v16, %v1633_v9 }
 0x4ee   : > { %v1276_v59 = vpop.permute.xlu0 %1275  ;;  %v1192_v33 = vpop.permute.xlu1 %1191 }
 0x4ef   : > { %v1214_v36 = vmul.f32 %v1192_v33, %v3070_v13  ;;  %v1669_v37 = vmul.f32 %v2462_v32, %v3259_v15  ;;  %v1319_v6 = vmul.f32 %v3063_v39, %v1276_v59 }
 0x4f1   : > { %v1230_v38 = vadd.f32 %v1214_v36, %v1134_v28 }
 0x4f2   : > { %v1284_v40 = vpop.permute.xlu0 %1283  ;;  %v1120_v12 = vpop.permute.xlu1 %1119 }
 0x4f3   : > { %v1678_v42 = vmul.f32 %v3003_v25, %v1230_v38  ;;  %v1136_v45 = vmul.f32 %v3063_v39, %v1120_v12  ;;  %v1321_v20 = vmul.f32 %v3063_v39, %v1284_v40 }
 0x4f5   : > { %v3265_v46 = vadd.f32 %v1678_v42, %v1669_v37 }
 0x4f6   : > { %v1292_v48 = vpop.permute.xlu0 %1291  ;;  %v1200_v49 = vpop.permute.xlu1 %1199 }
 0x4f7   : > { %v1216_v47 = vmul.f32 %v1200_v49, %v3070_v13  ;;  %v1705_v30 = vmul.f32 %v2464_v24, %v3265_v46  ;;  %v1323_v59 = vmul.f32 %v3063_v39, %v1292_v48 }
 0x4f9   : > { %v1232_v51 = vadd.f32 %v1216_v47, %v1136_v45 }
 0x4fa   : > { %v1300_v52 = vpop.permute.xlu0 %1299  ;;  %v1256_v4 = vpop.permute.xlu1 %1255 }
 0x4fb   : > { %v1714_v55 = vmul.f32 %v3006_v26, %v1232_v51  ;;  %v1325_v49 = vmul.f32 %v3063_v39, %v1300_v52 }
 0x4fd   : > { %v3270_v11 = vadd.f32 %v1714_v55, %v1705_v30 }
 0x4fe   : > { %v1308_v58 = vpop.permute.xlu0 %1307  ;;  %v1264_v25 = vpop.permute.xlu1 %1263 }
 0x502   : > { %v1332_v54 = vpop.permute.xlu0 %1331  ;;  %v1272_v60 = vpop.permute.xlu1 %1271 }
 0x503   : > { %v1393_v62 = vmul.f32 %v1332_v54, %v3070_v13 }
 0x505   : > { %v1409_v53 = vadd.f32 %v1393_v62, %v1313_v61  ;;  %v1316_v61 = vmul.f32 %v3063_v39, %v1264_v25 }
 0x506   : > { %v1340_v0 = vpop.permute.xlu0 %1339  ;;  %v1280_v2 = vpop.permute.xlu1 %1279 }
 0x507   : > { %v1468_v27 = vmul.f32 %v3090_v5, %v1409_v53  ;;  %v1395_v57 = vmul.f32 %v1340_v0, %v3070_v13 }
 0x509   : > { %v1411_v26 = vadd.f32 %v1395_v57, %v1315_v19 }
 0x50a   : > { %v1348_v21 = vpop.permute.xlu0 %1347  ;;  %v3277_v8 = vpop.permute.xlu1 %1287 }
 0x50b   : > { %v1504_v9 = vmul.f32 %v3133_v3, %v1411_v26  ;;  %v1397_v22 = vmul.f32 %v1348_v21, %v3070_v13  ;;  %v1318_v21 = vmul.f32 %v3063_v39, %v1272_v60 }
 0x50d   : > { %v1413_v10 = vadd.f32 %v1397_v22, %v1317_v23 }
 0x50e   : > { %v1356_v14 = vpop.permute.xlu0 %1355  ;;  %v3282_v16 = vpop.permute.xlu1 %1295 }
 0x50f   : > { %v1540_v5 = vmul.f32 %v3155_v41, %v1413_v10  ;;  %v1399_v28 = vmul.f32 %v1356_v14, %v3070_v13 }
 0x511   : > { %v1415_v32 = vadd.f32 %v1399_v28, %v1319_v6  ;;  %v1740_v6 = vsub.f32 0.0, %v2928_v44 }
 0x512   : > { %v1364_v33 = vpop.permute.xlu0 %1363  ;;  %v3287_v36 = vpop.permute.xlu1 %1303 }
 0x513   : > { %v1576_v3 = vmul.f32 %v3172_v56, %v1415_v32  ;;  %v1401_v37 = vmul.f32 %v1364_v33, %v3070_v13  ;;  %v1314_v56 = vmul.f32 %v3063_v39, %v1256_v4 }
 0x515   : > { %v1417_v38 = vadd.f32 %v1401_v37, %v1321_v20 }
 0x516   : > { %v1372_v12 = vpop.permute.xlu0 %1371  ;;  %v3292_v42 = vpop.permute.xlu1 %1311 }
 0x517   : > { %v3296_v41 = vmul.f32 %v3189_v18, %v1417_v38  ;;  %v1403_v45 = vmul.f32 %v1372_v12, %v3070_v13  ;;  %v1327_v18 = vmul.f32 %v3063_v39, %v1308_v58  ;;  %v1741_v12 = vmul.f32 1.442695, %v1740_v6 }
 0x519   : > { %v1419_v24 = vadd.f32 %v1403_v45, %v1323_v59  ;;  %2465 = vpow2.f32 %v1741_v12 }
 0x51a   : > { %v1380_v47 = vpop.permute.xlu0 %1379  ;;  %v1336_v40 = vpop.permute.xlu1 %1335 }
 0x51b   : > { %v3302_v30 = vmul.f32 %v3205_v29, %v1419_v24  ;;  %v1405_v51 = vmul.f32 %v1380_v47, %v3070_v13  ;;  %v1394_v55 = vmul.f32 %v1336_v40, %v3070_v13 }
 0x51d   : > { %v1421_v48 = vadd.f32 %v1405_v51, %v1325_v49  ;;  %v1410_v54 = vadd.f32 %v1394_v55, %v1314_v56 }
 0x51e   : > { %v1388_v62 = vpop.permute.xlu0 %1387  ;;  %v1344_v53 = vpop.permute.xlu1 %1343 }
 0x51f   : > { %v3309_v52 = vmul.f32 %v3222_v50, %v1421_v48  ;;  %v1469_v4 = vmul.f32 %v3101_v34, %v1410_v54  ;;  %v1407_v29 = vmul.f32 %v1388_v62, %v3070_v13  ;;  %v1396_v0 = vmul.f32 %v1344_v53, %v3070_v13 }
 0x521   : > { %v1470_v19 = vadd.f32 %v1469_v4, %v1468_v27  ;;  %v1423_v57 = vadd.f32 %v1407_v29, %v1327_v18  ;;  %v1412_v26 = vadd.f32 %v1396_v0, %v1316_v61  ;;  %v1320_v27 = vmul.f32 %v3063_v39, %v1280_v2 }
 0x522   : > { %v1352_v23 = vpop.permute.xlu1 %1351  ;;  %v1322_v2 = vmul.f32 %v3063_v39, %v3277_v8 }
 0x523   : > { %v1471_v58 = vrot.slane %v1470_v19, 4  ;;  %v3316_v25 = vmul.f32 %v3249_v31, %v1423_v57  ;;  %v1505_v22 = vmul.f32 %v3152_v35, %v1412_v26  ;;  %v1398_v50 = vmul.f32 %v1352_v23, %v3070_v13 }
 0x525   : > { %v1472_v10 = vadd.f32 %v1471_v58, %v1470_v19  ;;  %v1506_v34 = vadd.f32 %v1505_v22, %v1504_v9  ;;  %v1414_v14 = vadd.f32 %v1398_v50, %v1318_v21 }
 0x526   : > { %v1360_v28 = vpop.permute.xlu1 %1359 }
 0x527   : > { %v1473_v32 = vrot.slane %v1472_v10, 2  ;;  %v1507_v33 = vrot.slane %v1506_v34, 4  ;;  %v1541_v60 = vmul.f32 %v3187_v1, %v1414_v14  ;;  %v1400_v20 = vmul.f32 %v1360_v28, %v3070_v13 }
 0x529   : > { %v1474_v31 = vadd.f32 %v1473_v32, %v1472_v10  ;;  %v1508_v37 = vadd.f32 %v1507_v33, %v1506_v34  ;;  %v1542_v38 = vadd.f32 %v1541_v60, %v1540_v5  ;;  %v1416_v35 = vadd.f32 %v1400_v20, %v1320_v27  ;;  %v2466_v20 = vpop.eup %2465 }
 0x52a   : > { %v1368_v59 = vpop.permute.xlu1 %1367  ;;  %v1324_v5 = vmul.f32 %v3063_v39, %v3282_v16  ;;  %v1328_v10 = vmul.f32 %v3063_v39, %v3292_v42 }
 0x52b   : > { %v1475_v45 = vrot.slane %v1474_v31, 1  ;;  %v1509_v9 = vrot.slane %v1508_v37, 2  ;;  %v1543_v24 = vrot.slane %v1542_v38, 4  ;;  %v1577_v49 = vmul.f32 %v3220_v63, %v1416_v35 }
 0x52c   : > { %v1402_v47 = vmul.f32 %v1368_v59, %v3070_v13 }
 0x52d   : > { %v1476_v40 = vadd.f32 %v1475_v45, %v1474_v31  ;;  %v1510_v1 = vadd.f32 %v1509_v9, %v1508_v37  ;;  %v1544_v56 = vadd.f32 %v1543_v24, %v1542_v38  ;;  %v1578_v51 = vadd.f32 %v1577_v49, %v1576_v3 }
 0x52e   : > { %v1418_v55 = vadd.f32 %v1402_v47, %v1322_v2  ;;  %v1376_v48 = vpop.permute.xlu1 %1375  ;;  %v1326_v3 = vmul.f32 %v3063_v39, %v3287_v36 }
 0x52f   : > { %1477 = vst [vmem:[#allocation4] sm:$0x1] %v1476_v40  ;;  %v1511_v54 = vrot.slane %v1510_v1, 1  ;;  %v1545_v18 = vrot.slane %v1544_v56, 2  ;;  %v1579_v61 = vrot.slane %v1578_v51, 4  ;;  %v1404_v63 = vmul.f32 %v1376_v48, %v3070_v13 }
 0x530   : > { %v1613_v8 = vmul.f32 %v3251_v17, %v1418_v55 }
 0x531   : > { %v1512_v62 = vadd.f32 %v1511_v54, %v1510_v1  ;;  %v1546_v53 = vadd.f32 %v1545_v18, %v1544_v56  ;;  %v1580_v4 = vadd.f32 %v1579_v61, %v1578_v51  ;;  %v1420_v29 = vadd.f32 %v1404_v63, %v1324_v5  ;;  %v2475_v63 = vld [vmem:[%s2690_s21] sm:$0xff]  ;;  %s2065_s21 = scalar_lea.hbm %s3504_s18, %s2147_s29 }
 0x532   : > { %v1614_v0 = vadd.f32 %v1613_v8, %v3296_v41  ;;  %v1384_v16 = vpop.permute.xlu1 %1383 }
 0x533   : > { %1513 = vst [vmem:[#allocation4 + $0x1] sm:$0x1] %v1512_v62  ;;  %v1547_v19 = vrot.slane %v1546_v53, 1  ;;  %v1581_v57 = vrot.slane %v1580_v4, 2  ;;  %v1649_v26 = vmul.f32 %v3259_v15, %v1420_v29  ;;  %v1406_v21 = vmul.f32 %v1384_v16, %v3070_v13 }
 0x534   : > { %v1615_v23 = vrot.slane %v1614_v0, 4 }
 0x535   : > { %v1548_v58 = vadd.f32 %v1547_v19, %v1546_v53  ;;  %v1582_v17 = vadd.f32 %v1581_v57, %v1580_v4  ;;  %v1650_v22 = vadd.f32 %v1649_v26, %v3302_v30  ;;  %v1422_v50 = vadd.f32 %v1406_v21, %v1326_v3 }
 0x536   : > { %v1616_v36 = vadd.f32 %v1615_v23, %v1614_v0  ;;  %v1392_v34 = vpop.permute.xlu1 %1391  ;;  %v1872_v23 = vld [vmem:[%s3500_s14 + $0x18] sm:$0xff] }
 0x537   : > { %1549 = vst [vmem:[#allocation4 + $0x2] sm:$0x1] %v1548_v58  ;;  %v1583_v41 = vrot.slane %v1582_v17, 1  ;;  %v1651_v14 = vrot.slane %v1650_v22, 4  ;;  %v1685_v6 = vmul.f32 %v3265_v46, %v1422_v50  ;;  %v1408_v15 = vmul.f32 %v1392_v34, %v3070_v13  ;;  %v1871_v58 = vld [vmem:[%s3500_s14 + $0x10] sm:$0xff]  ;;  %v1973_v50 = vld [vmem:[%s3502_s16 + $0x78] sm:$0xff] }
 0x538   : > { %v1617_v27 = vrot.slane %v1616_v36, 2  ;;  %v1743_v13 = vadd.f32 1.0, %v2466_v20  ;;  %2347 = vmatpush3.msra.mxu1 %v1973_v50  ;;  %v1970_v34 = vld [vmem:[%s3502_s16 + $0x60] sm:$0xff]  ;;  %v1968_v20 = vld [vmem:[%s3502_s16 + $0x50] sm:$0xff] }
 0x539   : > { %v1584_v28 = vadd.f32 %v1583_v41, %v1582_v17  ;;  %v1652_v32 = vadd.f32 %v1651_v14, %v1650_v22  ;;  %v1686_v33 = vadd.f32 %v1685_v6, %v3309_v52  ;;  %v1424_v60 = vadd.f32 %v1408_v15, %v1328_v10  ;;  %v1870_v17 = vld [vmem:[%s3500_s14 + $0x8] sm:$0xff]  ;;  %v1869_v22 = vld [vmem:[%s3500_s14] sm:$0xff]  ;;  %v1972_v10 = vld [vmem:[%s3502_s16 + $0x70] sm:$0xff]  ;;  %2348 = vmatprep.subr.mxu1 %v2538_v7 }
 0x53a   : > { %v1618_v30 = vadd.f32 %v1617_v27, %v1616_v36  ;;  %2467 = vrcp.f32 %v1743_v13  ;;  %v1971_v36 = vld [vmem:[%s3502_s16 + $0x68] sm:$0xff]  ;;  %2349 = vmatpush3.msra.mxu1 %v1972_v10  ;;  %v2141_v27 = vld [vmem:[%s3498_s12] ss:$0 sm:$0xff] }
 0x53b   : > { %1585 = vst [vmem:[#allocation4 + $0x3] sm:$0x1] %v1584_v28  ;;  %v1653_v31 = vrot.slane %v1652_v32, 2  ;;  %v1687_v39 = vrot.slane %v1686_v33, 4  ;;  %v1721_v42 = vmul.f32 %v3270_v11, %v1424_v60  ;;  %2350 = vmatprep.subr.mxu1 %v2538_v7  ;;  %v1959_v13 = vld [vmem:[%s3502_s16 + $0x8] sm:$0xff] }
 0x53c   : > { %v1619_v37 = vrot.slane %v1618_v30, 1  ;;  %2351 = vmatpush3.msra.mxu1 %v1971_v36 }
 0x53d   : > { %v1654_v38 = vadd.f32 %v1653_v31, %v1652_v32  ;;  %v1688_v35 = vadd.f32 %v1687_v39, %v1686_v33  ;;  %v1722_v46 = vadd.f32 %v1721_v42, %v3316_v25  ;;  %v2140_v25 = vld [vmem:[%s3496_s10] ss:$0 sm:$0xff]  ;;  %2352 = vmatprep.subr.mxu1 %v2538_v7  ;;  %v1967_v31 = vld [vmem:[%s3502_s16 + $0x48] sm:$0xff]  ;;  %v1965_v42 = vld [vmem:[%s3502_s16 + $0x38] sm:$0xff] }
 0x53e   : > { %v1620_v12 = vadd.f32 %v1619_v37, %v1618_v30  ;;  %v1738_v5 = vmul.f32 %v2140_v25, %v2920_v43  ;;  %2353 = vmatpush3.msra.mxu1 %v1970_v34  ;;  %v2142_v32 = vld [vmem:[%s3499_s13] ss:$0 sm:$0xff]  ;;  %v1969_v30 = vld [vmem:[%s3502_s16 + $0x58] sm:$0xff]  ;;  %v1964_v37 = vld [vmem:[%s3502_s16 + $0x30] sm:$0xff] }
 0x53f   : > { %v1655_v59 = vrot.slane %v1654_v38, 1  ;;  %v1689_v45 = vrot.slane %v1688_v35, 2  ;;  %v1723_v9 = vrot.slane %v1722_v46, 4  ;;  %2354 = vmatprep.subr.mxu1 %v2538_v7  ;;  %v1966_v39 = vld [vmem:[%s3502_s16 + $0x40] sm:$0xff] }
 0x540   : > { %1621 = vst [vmem:[#allocation4 + $0x4] sm:$0x1] %v1620_v12  ;;  %2355 = vmatpush3.msra.mxu1 %v1969_v30  ;;  %v1960_v12 = vld [vmem:[%s3502_s16 + $0x10] sm:$0xff] }
 0x541   : > { %v1656_v52 = vadd.f32 %v1655_v59, %v1654_v38  ;;  %v1690_v24 = vadd.f32 %v1689_v45, %v1688_v35  ;;  %v1724_v49 = vadd.f32 %v1723_v9, %v1722_v46  ;;  %2356 = vmatprep.subr.mxu1 %v2538_v7  ;;  %v1963_v38 = vld [vmem:[%s3502_s16 + $0x28] sm:$0xff]  ;;  %v1962_v35 = vld [vmem:[%s3502_s16 + $0x20] sm:$0xff]  ;;  %v1961_v46 = vld [vmem:[%s3502_s16 + $0x18] sm:$0xff] }
 0x542   : > { %2357 = vmatpush3.msra.mxu1 %v1968_v20  ;;  %v1958_v59 = vld [vmem:[%s3502_s16] sm:$0xff] }
 0x543   : > { %1657 = vst [vmem:[#allocation4 + $0x5] sm:$0x1] %v1656_v52  ;;  %v1691_v2 = vrot.slane %v1690_v24, 1  ;;  %v1725_v47 = vrot.slane %v1724_v49, 2  ;;  %2358 = vmatprep.subr.mxu1 %v2538_v7  ;;  %v2143_v45 = vld [vmem:[%s3501_s15] ss:$0 sm:$0xff] }
 0x544   : > { %2359 = vmatpush3.msra.mxu1 %v1967_v31 }
 0x545   : > { %v1692_v40 = vadd.f32 %v1691_v2, %v1690_v24  ;;  %v1726_v11 = vadd.f32 %v1725_v47, %v1724_v49  ;;  %2360 = vmatprep.subr.mxu1 %v2538_v7 }
 0x546   : > { %2361 = vmatpush3.msra.mxu1 %v1966_v39 }
 0x547   : > { %1693 = vst [vmem:[#allocation4 + $0x6] sm:$0x1] %v1692_v40  ;;  %v1727_v1 = vrot.slane %v1726_v11, 1  ;;  %v2468_v51 = vpop.eup %2467  ;;  %2362 = vmatprep.subr.mxu1 %v2538_v7 }
 0x548   : > { %v1746_v48 = vmul.f32 %v2468_v51, %v2928_v44  ;;  %2363 = vmatpush3.msra.mxu1 %v1965_v42 }
 0x549   : > { %v1728_v56 = vadd.f32 %v1727_v1, %v1726_v11  ;;  %2364 = vmatprep.subr.mxu1 %v2538_v7 }
 0x54a   : > { %2365 = vmatpush3.msra.mxu1 %v1964_v37 }
 0x54b   : > { %1729 = vst [vmem:[#allocation4 + $0x7] sm:$0x1] %v1728_v56  ;;  %2366 = vmatprep.subr.mxu1 %v2538_v7 }
 0x54c   : > { %2367 = vmatpush3.msra.mxu1 %v1963_v38 }
 0x54d   : > { %2368 = vmatprep.subr.mxu1 %v2538_v7 }
 0x54e   : > { %2369 = vmatpush3.msra.mxu1 %v1962_v35 }
 0x54f   : > { %2370 = vmatprep.subr.mxu1 %v2538_v7 }
 0x550   : > { %2371 = vmatpush3.msra.mxu1 %v1961_v46 }
 0x551   : > { %2372 = vmatprep.subr.mxu1 %v2538_v7 }
 0x552   : > { %v1730_v55 = vld [vmem:[#allocation4] sm:$0xff]  ;;  %2373 = vmatpush3.msra.mxu1 %v1960_v12 }
 0x553   : > { %v1739_v54 = vadd.f32 %v1738_v5, %v1730_v55  ;;  %2374 = vmatprep.subr.mxu1 %v2538_v7 }
 0x554   : > { %2375 = vmatpush3.msra.mxu1 %v1959_v13 }
 0x555   : > { %v1747_v18 = vmul.f32 %v1746_v48, %v1739_v54  ;;  %2376 = vmatprep.subr.mxu1 %v2538_v7 }
 0x556   : > { %2377 = vmatpush3.msra.mxu1 %v1958_v59 }
 0x557   : > { %2333 = vmatmul.mubr.f32.vlgmr.msra.gmra.mxu0 %v1747_v18 }
 0x558   : > { %2343 = vmatprep.mubr.msk.f32.mxu0 %vm2539_vm1, %v2538_v7  ;;  %2336 = vmatpush3.msra.mxu0 %v1872_v23 }
 0x559   : > { %2337 = vmatprep.subr.mxu0 %v2538_v7 }
 0x55a   : > { %2338 = vmatpush3.msra.mxu0 %v1871_v58 }
 0x55b   : > { %2339 = vmatprep.subr.mxu0 %v2538_v7 }
 0x55c   : > { %2340 = vmatpush3.msra.mxu0 %v1870_v17 }
 0x55d   : > { %2341 = vmatprep.subr.mxu0 %v2538_v7  ;;  %v2145_v7 = vld [vmem:[%s3503_s17] ss:$0 sm:$0xff] }
 0x55e   : > { %2342 = vmatpush3.msra.mxu0 %v1869_v22 }
 0x617   : > { %v1830_v61 = vpop.f32.mrf.mxu0 }
 0x618   : > { %v1831_v8 = vadd.f32 %v2475_v63, %v1830_v61 }
 0x619   : > { %v2334_v62 = vpop.f32.mrf.mxu0 }
 0x61a   : > { %v1835_v53 = vmul.f32 0.70710677, %v1831_v8  ;;  %v1834_v29 = vmul.f32 0.5, %v1831_v8 }
 0x61c   : > { %2469 = verf.f32 %v1835_v53 }
 0x629   : > { %v2470_v4 = vpop.eup %2469 }
 0x62a   : > { %v1837_v3 = vadd.f32 1.0, %v2470_v4 }
 0x62c   : > { %v1838_v0 = vmul.f32 %v1837_v3, %v1834_v29 }
 0x62e   : > { %v3353_v43 = vadd.f32 %v2475_v63, %v1838_v0 }
 0x630   : > { %v1842_v44 = vsel %vm574_vm0, %v3353_v43, 0.0 }
 0x631   : > { %1843 = vadd.xlane.f32.xlu0 %v1842_v44 }
 0x6ba   : > { %v1844_v16 = vpop.xlane.xlu0 %1843 }
 0x6bb   : > { %v1845_v19 = vmul.f32 0.03125, %v1844_v16 }
 0x6bd   : > { %v1846_v57 = vsub.f32 %v3353_v43, %v1845_v19 }
 0x6bf   : > { %v1847_v26 = vmul.f32 %v1846_v57, %v1846_v57 }
 0x6c1   : > { %v1848_v21 = vsel %vm574_vm0, %v1847_v26, 0.0 }
 0x6c2   : > { %1849 = vadd.xlane.f32.xlu1 %v1848_v21 }
 0x74b   : > { %v1850_v41 = vpop.xlane.xlu1 %1849 }
 0x74c   : > { %v1851_v14 = vmul.f32 0.03125, %v1850_v41 }
 0x74e   : > { %v1852_v6 = vadd.f32 1e-05, %v1851_v14 }
 0x750   : > { %2471 = vrsqrt.f32 %v1852_v6 }
 0x75d   : > { %v2472_v15 = vpop.eup %2471 }
 0x75e   : > { %v1854_v28 = vmul.f32 %v2472_v15, %v1846_v57 }
 0x760   : > { %v1861_v33 = vmul.f32 %v2141_v27, %v1854_v28 }
 0x762   : > { %v1868_v60 = vadd.f32 %v2142_v32, %v1861_v33 }
 0x764   : > { %2344 = vmatmul.mubr.msk.f32.vlgmr.msra.gmra.mxu0 %vm574_vm0, %v1868_v60 }
 0x824   : > { %v1949_v9 = vpop.f32.mrf.mxu0 }
 0x825   : > { %v1950_v52 = vadd.f32 %v2143_v45, %v1949_v9 }
 0x826   : > { %v2345_v24 = vpop.f32.mrf.mxu0 }
 0x827   : > { %v1954_v49 = vmul.f32 0.70710677, %v1950_v52  ;;  %v1953_v47 = vmul.f32 0.5, %v1950_v52 }
 0x829   : > { %2473 = verf.f32 %v1954_v49 }
 0x836   : > { %v2474_v2 = vpop.eup %2473 }
 0x837   : > { %v1956_v40 = vadd.f32 1.0, %v2474_v2 }
 0x839   : > { %v1957_v11 = vmul.f32 %v1956_v40, %v1953_v47 }
 0x83b   : > { %2379 = vmatmul.mubr.f32.vlgmr.msra.gmra.mxu1 %v1957_v11 }
 0x8fb   : > { %v2047_v1 = vpop.f32.mrf.mxu1 }
 0x8fc   : > { %v2048_v56 = vadd.f32 %v2145_v7, %v2047_v1 }
 0x8fd   : > { %v2380_v25 = vpop.f32.mrf.mxu1 }
 0x8fe   : > { %v2051_v51 = vadd.f32 %v2048_v56, %v3353_v43 }
 0x900   : > { %2052 = vst.msk [vmem:[%s566_s1] sm:$0xff] %vm574_vm0, %v2051_v51 }
 0x901   : > { %2489 = shalt.err (!%p2486_p3)
}
 0x902   : > { %s2490_s20 = scalar_lea.hbm %s2065_s21, 128  ;;  %s2494_s1 = scalar_lea.hbm %s3504_s18, 256 }
 0x903   : > { %p2491_p4 = scmp.ne.s32.totalorder %s2065_s21, %s2490_s20  ;;  %p2495_p9 = scmp.lt.s32.totalorder %s2065_s21, %s3504_s18 }
 0x904   : > { %p2496_p10 = scmp.lt.s32.totalorder %s2494_s1, %s2490_s20 }
 0x905   : > { %p2492_p7 = pnand %p2491_p4, %p2675_p5 }
 0x906   : > { %p2497_p11 = por %p2496_p10, %p2495_p9 }
 0x907   : > { %p2493_p8 = pneg %p2492_p7 }
 0x909   : > { %p2498_p12 = pnand %p2497_p11, %p2493_p8 }
 0x90b   : > { %2501 = shalt.err (!%p2498_p12)
}
 0x90c   : > { %2381 = dma.vmem_to_hbm [thread:$0]  (%p2675_p5), %s2068_s27, 128, %s2065_s21, %s2054_s25  }
 0x90d PF: > { %s3525_s3 = sld [smem:[#allocation8_spill]]  ;;  %p2387_p13 = scmp.ge.s32.totalorder %s2536_s30, 2 }
 0x90f   : > { %p2384_p0 = pnand %p2387_p13, %p2679_p6 }
 0x911   : > { %p2385_p1 = pneg %p2384_p0 }
 0x913   : > { %s2079_s19 = sand.u32 1, %s3525_s3  }
 0x914   : > { %s2080_s22 = scalar_lea.sflag [#allocation6], %s2079_s19 }
 0x915   : > { %2519 = dma.done.wait (%p2385_p1), %s2080_s22, 128  }
 0x916   : > { %2521 = vsyncadd (%p2385_p1), %s2080_s22, 4294967168  ;;  %s3527_s30 = sld [smem:[#allocation10_spill]]  ;;  %s3530_s27 = smov %s2528_s28 }
 0x917   : > { %s3528_s20 = sld [smem:[#allocation9_spill]] }
 0x918   : > { %s3529_s29 = sld [smem:[#allocation11_spill]] }
 0x91c   : > { %p28_p2 = scmp.ge.s32.totalorder %s3527_s30, 4  }
 0x91d   : > { %s3531_s28 = smov %s3528_s20 }
 0x91e   :  { %30 = sbr.rel (!%p28_p2) target bundleno = 8 (0x8), region = 141 }
 0x923   :  { %2085 = vsyncpa [#allocation6], 1 }
 0x924   :  { %2087 = vsyncpa [#allocation6 + $0x1], 1 }

</bundles_post_ra>
